<compile_context>
chip_gen: v7x
topology: tpu7x:2x2x1
jax: 0.10.0
libtpu: 0.0.40
codegen_flags: <defaults>
</compile_context>

<pallas_src>
import jax
import jax.numpy as jnp
from jax.experimental import pallas as pl
from jax.experimental.pallas import tpu as pltpu


def conv_relu_pool_kernel(xe_ref, xo_ref, w_ref, b_ref, eye_ref, o_ref):
    # xe_ref/xo_ref: (TB, 1, TR+2, Wo+1) even/odd columns of the padded rows
    # w_ref        : (9, 2*Cout) conv weights, tap-major, duplicated along lanes
    # b_ref        : (1, Cout)   conv bias
    # eye_ref      : (Cout, Cout) f32 identity (MXU channels-major helper)
    # o_ref        : (TB, Cout, (TR//2)*Wo) pooled output, channels-major (NCHW flat)
    TB = xe_ref.shape[0]
    TRp2 = xe_ref.shape[2]
    TR = TRp2 - 2
    TRo = TR // 2
    Wo = xe_ref.shape[3] - 1
    C = b_ref.shape[1]
    C2 = 2 * C

    w = w_ref[...]                       # (9, 2C)
    b = b_ref[...]                       # (1, C)
    eye = eye_ref[...]                   # (C, C)

    plane_shape = (TRp2, Wo, C2)
    lane = jax.lax.broadcasted_iota(jnp.int32, plane_shape, 2)
    even_half = lane < C                 # lanes [0,C): even output column of the pair

    def make_plane(src_even, src_odd):
        # src_*: (TRp2, Wo).  Result lanes [0,C) = src_even, lanes [C,2C) = src_odd.
        # This is the only cross-lane relayout; it is done 3x per tile (not 9x).
        e = jnp.broadcast_to(src_even[:, :, None], plane_shape)
        o = jnp.broadcast_to(src_odd[:, :, None], plane_shape)
        return jnp.where(even_half, e, o)

    for n in range(TB):                  # TB <= 8, unrolled at trace time
        xe = xe_ref[n, 0]                # (TRp2, Wo+1): padded columns 0,2,4,...
        xo = xo_ref[n, 0]                # (TRp2, Wo+1): padded columns 1,3,5,...

        # Tap plane for kx: lanes [0,C) need column 2*wo+kx, lanes [C,2C) column 2*wo+1+kx.
        planes = (
            make_plane(xe[:, :Wo], xo[:, :Wo]),            # kx = 0
            make_plane(xo[:, :Wo], xe[:, 1:Wo + 1]),       # kx = 1
            make_plane(xe[:, 1:Wo + 1], xo[:, 1:Wo + 1]),  # kx = 2
        )

        # 3x3 conv = 9 lane-dense VPU multiply-adds (three independent ky chains).
        row_sums = []
        for ky in range(3):
            s = planes[0][ky:ky + TR] * w[3 * ky + 0]
            s = s + planes[1][ky:ky + TR] * w[3 * ky + 1]
            s = s + planes[2][ky:ky + TR] * w[3 * ky + 2]
            row_sums.append(s)
        acc = (row_sums[0] + row_sums[1]) + row_sums[2]    # (TR, Wo, 2C)

        # MaxPool2d(2): width pairs are the two 64-lane halves; height pairs are
        # adjacent row pairs (major-dim split, free).
        wmax = jnp.maximum(acc[:, :, :C], acc[:, :, C:])   # (TR, Wo, C)
        hpair = wmax.reshape(TRo, 2, Wo, C)
        pooled = jnp.maximum(hpair[:, 0], hpair[:, 1])     # (TRo, Wo, C)

        # Bias + ReLU commute with max-pool -> apply once on the 4x smaller tile.
        pooled = jnp.maximum(pooled + b, 0.0)

        # Channels-major (NCHW) via the idle MXU: out[c, m] = sum_k eye[c,k]*pooled[m,k].
        # Exact (identity weights) at HIGHEST precision; avoids an XLU transpose and
        # the wrapper-side HBM transpose entirely.
        p2d = pooled.reshape(TRo * Wo, C)
        chan = jax.lax.dot_general(
            eye, p2d, (((1,), (1,)), ((), ())),
            precision=jax.lax.Precision.HIGHEST,
            preferred_element_type=jnp.float32)            # (C, TRo*Wo)
        o_ref[n] = chan.astype(o_ref.dtype)


def _choose_tiles(N, H, W, Cout):
    """Pick (batch tile TB, row tile TR): keep the per-step VMEM working set a
    few MiB (v5e 16 MiB scoped / v7x 64 MiB physical), pack small images to
    amortize per-step overhead, and keep >=2 parallel grid steps when possible
    so both v7x TensorCores get work."""
    Wo = W // 2
    budget = 10 * 1024 * 1024

    def step_bytes(tb, tr):
        plane = (tr + 2) * Wo * 2 * Cout * 4            # one full-lane working plane
        work = 8 * plane                                # 3 tap planes + acc + temps
        inp = 2 * 2 * (tr + 2) * (Wo + 1) * 4           # xe/xo blocks, double buffered
        out = 2 * Cout * (tr // 2) * Wo * 4             # output block, double buffered
        return tb * (work + inp + out)

    # Row tile: even divisor of H.  If H is split, the output block's minor dim
    # (tr/2 * Wo) must stay a multiple of 128 (Pallas (8,128) tiling rule).
    cands = [d for d in range(2, H + 1, 2) if H % d == 0]
    valid = [d for d in cands if d == H or ((d // 2) * Wo) % 128 == 0]
    fitting = [d for d in valid if step_bytes(1, d) <= budget]
    tr = max(fitting) if fitting else min(valid)

    tb = 1
    for cand in range(min(N, 8), 0, -1):                # cap per-step unroll at 8
        if N % cand == 0 and step_bytes(cand, tr) <= budget:
            tb = cand
            break

    if (N // tb) * (H // tr) < 2 and tb > 1:            # feed both v7x TensorCores
        tb = max(d for d in range(1, tb) if N % d == 0)
    return tb, tr


def cnn_model_forward(x, weight, bias):
    """x: (N, 1, H, W). weight: (Cout, 1, 3, 3). bias: (Cout,).
    Returns (N, Cout, H//2, W//2), matching CNNModel.forward (decoder = identity)."""
    N, Cin, H, W = x.shape
    assert Cin == 1, "Conv2d(1, 64, ...) expects a single input channel"
    assert H % 2 == 0 and W % 2 == 0, "odd spatial sizes (MaxPool2d floor) not supported"
    Cout = weight.shape[0]
    Ho, Wo = H // 2, W // 2

    TB, TR = _choose_tiles(N, H, W, Cout)
    NR = H // TR
    TRo, TRp2, Wo1 = TR // 2, TR + 2, Wo + 1

    # One fused XLA pass over the input: zero pad + even/odd column split
    # (+ overlapping halo row windows when row-tiled).  No HBM im2col.
    xpad = jnp.pad(x[:, 0].astype(jnp.float32), ((0, 0), (1, 1), (1, 1)))  # (N, H+2, W+2)
    xe = xpad[:, :, 0::2]                                # (N, H+2, Wo+1)
    xo = xpad[:, :, 1::2]                                # (N, H+2, Wo+1)
    if NR == 1:
        xe_t, xo_t = xe[:, None], xo[:, None]
    else:
        xe_t = jnp.stack([xe[:, r * TR:r * TR + TRp2] for r in range(NR)], axis=1)
        xo_t = jnp.stack([xo[:, r * TR:r * TR + TRp2] for r in range(NR)], axis=1)

    w2 = weight.reshape(Cout, 9).T.astype(jnp.float32)   # (9, Cout), tap-major
    wdup = jnp.concatenate([w2, w2], axis=1)             # (9, 2*Cout) duplicated for dense lanes
    b2 = bias.reshape(1, Cout).astype(jnp.float32)
    eye = jnp.eye(Cout, dtype=jnp.float32)

    out_flat = pl.pallas_call(
        conv_relu_pool_kernel,
        out_shape=jax.ShapeDtypeStruct((N, Cout, Ho * Wo), jnp.float32),
        grid=(N // TB, NR),
        in_specs=[
            pl.BlockSpec((TB, 1, TRp2, Wo1), lambda bi, ri: (bi, ri, 0, 0)),
            pl.BlockSpec((TB, 1, TRp2, Wo1), lambda bi, ri: (bi, ri, 0, 0)),
            pl.BlockSpec((9, 2 * Cout), lambda bi, ri: (0, 0)),
            pl.BlockSpec((1, Cout), lambda bi, ri: (0, 0)),
            pl.BlockSpec((Cout, Cout), lambda bi, ri: (0, 0)),
        ],
        out_specs=pl.BlockSpec((TB, Cout, TRo * Wo), lambda bi, ri: (bi, 0, ri)),
        compiler_params=pltpu.CompilerParams(
            dimension_semantics=("parallel", "parallel"),
            vmem_limit_bytes=32 * 1024 * 1024),
    )(xe_t, xo_t, wdup, b2, eye)

    # Free reshape: the kernel already produced channels-major (NCHW) data.
    return out_flat.reshape(N, Cout, Ho, Wo).astype(x.dtype)


def ref_forward(x, weight, bias):
    """Pure-JAX reference of the PyTorch forward (f32-accurate)."""
    y = jax.lax.conv_general_dilated(
        x, weight, window_strides=(1, 1), padding="SAME",
        dimension_numbers=("NCHW", "OIHW", "NCHW"),
        precision=jax.lax.Precision.HIGHEST)
    y = y + bias[None, :, None, None]
    y = jnp.maximum(y, 0.0)
    N, C, H, W = y.shape
    return y.reshape(N, C, H // 2, 2, W // 2, 2).max(axis=(3, 5))


if __name__ == "__main__":
    key = jax.random.PRNGKey(0)
    kx, kw, kb = jax.random.split(key, 3)

    # Small shapes consistent with the module: Conv2d expects 1 input channel.
    N, H, W, Cout = 2, 16, 16, 64
    x = jax.random.normal(kx, (N, 1, H, W), jnp.float32)

    # Deterministic synthetic parameters (shapes from nn.Conv2d(1, 64, 3)).
    weight = jax.random.normal(kw, (Cout, 1, 3, 3), jnp.float32) * 0.1
    bias = jax.random.normal(kb, (Cout,), jnp.float32) * 0.1

    out = jax.block_until_ready(cnn_model_forward(x, weight, bias))
    ref = jax.block_until_ready(ref_forward(x, weight, bias))

    assert out.shape == (N, Cout, H // 2, W // 2), out.shape
    err = float(jnp.abs(out - ref).max())
    assert jnp.allclose(out, ref, atol=1e-4, rtol=1e-4), err

    print("KERNEL_OK")
</pallas_src>

<mosaic_0001>
module attributes {stable_mosaic.version = 11 : i64} {
  func.func @conv_relu_pool_kernel(%arg0: i32, %arg1: i32, %arg2: memref<1x1x18x9xf32, #tpu.memory_space<vmem>>, %arg3: memref<1x1x18x9xf32, #tpu.memory_space<vmem>>, %arg4: memref<9x128xf32, #tpu.memory_space<vmem>>, %arg5: memref<1x64xf32, #tpu.memory_space<vmem>>, %arg6: memref<64x64xf32, #tpu.memory_space<vmem>>, %arg7: memref<1x64x64xf32, #tpu.memory_space<vmem>>) attributes {dimension_semantics = [#tpu.dimension_semantics<parallel>, #tpu.dimension_semantics<parallel>], iteration_bounds = array<i64: 2, 1>, scalar_prefetch = 0 : i64, scratch_operands = 0 : i64, tpu.core_type = #tpu.core_type<tc>, window_params = [{transform_indices = @transform_0, window_bounds = array<i64: 1, 1, 18, 9>}, {transform_indices = @transform_1, window_bounds = array<i64: 1, 1, 18, 9>}, {pipeline_mode = #tpu.pipeline_mode<synchronous>, transform_indices = @transform_2, window_bounds = array<i64: 9, 128>}, {pipeline_mode = #tpu.pipeline_mode<synchronous>, transform_indices = @transform_3, window_bounds = array<i64: 1, 64>}, {pipeline_mode = #tpu.pipeline_mode<synchronous>, transform_indices = @transform_4, window_bounds = array<i64: 64, 64>}, {transform_indices = @transform_5, window_bounds = array<i64: 1, 64, 64>}]} {
    %c0 = arith.constant 0 : index
    %c0_0 = arith.constant 0 : index
    %0 = vector.load %arg4[%c0, %c0_0] : memref<9x128xf32, #tpu.memory_space<vmem>>, vector<9x128xf32>
    %c0_1 = arith.constant 0 : index
    %c0_2 = arith.constant 0 : index
    %1 = vector.load %arg5[%c0_1, %c0_2] : memref<1x64xf32, #tpu.memory_space<vmem>>, vector<1x64xf32>
    %c0_3 = arith.constant 0 : index
    %c0_4 = arith.constant 0 : index
    %2 = vector.load %arg6[%c0_3, %c0_4] : memref<64x64xf32, #tpu.memory_space<vmem>>, vector<64x64xf32>
    %3 = tpu.iota {dimensions = array<i32: 2>} : vector<18x8x128xi32>
    %c64_i32 = arith.constant 64 : i32
    %4 = vector.broadcast %c64_i32 : i32 to vector<18x8x128xi32>
    %5 = arith.cmpi slt, %3, %4 : vector<18x8x128xi32>
    %c0_5 = arith.constant 0 : index
    %c0_6 = arith.constant 0 : index
    %c0_7 = arith.constant 0 : index
    %c0_8 = arith.constant 0 : index
    %6 = vector.load %arg2[%c0_5, %c0_6, %c0_7, %c0_8] : memref<1x1x18x9xf32, #tpu.memory_space<vmem>>, vector<1x1x18x9xf32>
    %7 = vector.shape_cast %6 : vector<1x1x18x9xf32> to vector<18x9xf32>
    %c0_9 = arith.constant 0 : index
    %c0_10 = arith.constant 0 : index
    %c0_11 = arith.constant 0 : index
    %c0_12 = arith.constant 0 : index
    %8 = vector.load %arg3[%c0_9, %c0_10, %c0_11, %c0_12] : memref<1x1x18x9xf32, #tpu.memory_space<vmem>>, vector<1x1x18x9xf32>
    %9 = vector.shape_cast %8 : vector<1x1x18x9xf32> to vector<18x9xf32>
    %10 = vector.extract_strided_slice %7 {offsets = [0, 0], sizes = [18, 8], strides = [1, 1]} : vector<18x9xf32> to vector<18x8xf32>
    %11 = vector.extract_strided_slice %9 {offsets = [0, 0], sizes = [18, 8], strides = [1, 1]} : vector<18x9xf32> to vector<18x8xf32>
    %12 = vector.shape_cast %10 : vector<18x8xf32> to vector<18x8x1xf32>
    %13 = vector.shape_cast %12 : vector<18x8x1xf32> to vector<18x8x1xf32>
    %14 = vector.broadcast %13 : vector<18x8x1xf32> to vector<18x8x128xf32>
    %15 = vector.shape_cast %11 : vector<18x8xf32> to vector<18x8x1xf32>
    %16 = vector.shape_cast %15 : vector<18x8x1xf32> to vector<18x8x1xf32>
    %17 = vector.broadcast %16 : vector<18x8x1xf32> to vector<18x8x128xf32>
    %18 = arith.select %5, %14, %17 : vector<18x8x128xi1>, vector<18x8x128xf32>
    %19 = vector.extract_strided_slice %9 {offsets = [0, 0], sizes = [18, 8], strides = [1, 1]} : vector<18x9xf32> to vector<18x8xf32>
    %20 = vector.extract_strided_slice %7 {offsets = [0, 1], sizes = [18, 8], strides = [1, 1]} : vector<18x9xf32> to vector<18x8xf32>
    %21 = vector.shape_cast %19 : vector<18x8xf32> to vector<18x8x1xf32>
    %22 = vector.shape_cast %21 : vector<18x8x1xf32> to vector<18x8x1xf32>
    %23 = vector.broadcast %22 : vector<18x8x1xf32> to vector<18x8x128xf32>
    %24 = vector.shape_cast %20 : vector<18x8xf32> to vector<18x8x1xf32>
    %25 = vector.shape_cast %24 : vector<18x8x1xf32> to vector<18x8x1xf32>
    %26 = vector.broadcast %25 : vector<18x8x1xf32> to vector<18x8x128xf32>
    %27 = arith.select %5, %23, %26 : vector<18x8x128xi1>, vector<18x8x128xf32>
    %28 = vector.extract_strided_slice %7 {offsets = [0, 1], sizes = [18, 8], strides = [1, 1]} : vector<18x9xf32> to vector<18x8xf32>
    %29 = vector.extract_strided_slice %9 {offsets = [0, 1], sizes = [18, 8], strides = [1, 1]} : vector<18x9xf32> to vector<18x8xf32>
    %30 = vector.shape_cast %28 : vector<18x8xf32> to vector<18x8x1xf32>
    %31 = vector.shape_cast %30 : vector<18x8x1xf32> to vector<18x8x1xf32>
    %32 = vector.broadcast %31 : vector<18x8x1xf32> to vector<18x8x128xf32>
    %33 = vector.shape_cast %29 : vector<18x8xf32> to vector<18x8x1xf32>
    %34 = vector.shape_cast %33 : vector<18x8x1xf32> to vector<18x8x1xf32>
    %35 = vector.broadcast %34 : vector<18x8x1xf32> to vector<18x8x128xf32>
    %36 = arith.select %5, %32, %35 : vector<18x8x128xi1>, vector<18x8x128xf32>
    %37 = vector.extract_strided_slice %18 {offsets = [0, 0, 0], sizes = [16, 8, 128], strides = [1, 1, 1]} : vector<18x8x128xf32> to vector<16x8x128xf32>
    %38 = vector.extract_strided_slice %0 {offsets = [0, 0], sizes = [1, 128], strides = [1, 1]} : vector<9x128xf32> to vector<1x128xf32>
    %39 = vector.shape_cast %38 : vector<1x128xf32> to vector<128xf32>
    %40 = vector.shape_cast %39 : vector<128xf32> to vector<1x1x128xf32>
    %41 = vector.broadcast %40 : vector<1x1x128xf32> to vector<16x8x128xf32>
    %42 = arith.mulf %37, %41 : vector<16x8x128xf32>
    %43 = vector.extract_strided_slice %27 {offsets = [0, 0, 0], sizes = [16, 8, 128], strides = [1, 1, 1]} : vector<18x8x128xf32> to vector<16x8x128xf32>
    %44 = vector.extract_strided_slice %0 {offsets = [1, 0], sizes = [1, 128], strides = [1, 1]} : vector<9x128xf32> to vector<1x128xf32>
    %45 = vector.shape_cast %44 : vector<1x128xf32> to vector<128xf32>
    %46 = vector.shape_cast %45 : vector<128xf32> to vector<1x1x128xf32>
    %47 = vector.broadcast %46 : vector<1x1x128xf32> to vector<16x8x128xf32>
    %48 = arith.mulf %43, %47 : vector<16x8x128xf32>
    %49 = arith.addf %42, %48 : vector<16x8x128xf32>
    %50 = vector.extract_strided_slice %36 {offsets = [0, 0, 0], sizes = [16, 8, 128], strides = [1, 1, 1]} : vector<18x8x128xf32> to vector<16x8x128xf32>
    %51 = vector.extract_strided_slice %0 {offsets = [2, 0], sizes = [1, 128], strides = [1, 1]} : vector<9x128xf32> to vector<1x128xf32>
    %52 = vector.shape_cast %51 : vector<1x128xf32> to vector<128xf32>
    %53 = vector.shape_cast %52 : vector<128xf32> to vector<1x1x128xf32>
    %54 = vector.broadcast %53 : vector<1x1x128xf32> to vector<16x8x128xf32>
    %55 = arith.mulf %50, %54 : vector<16x8x128xf32>
    %56 = arith.addf %49, %55 : vector<16x8x128xf32>
    %57 = vector.extract_strided_slice %18 {offsets = [1, 0, 0], sizes = [16, 8, 128], strides = [1, 1, 1]} : vector<18x8x128xf32> to vector<16x8x128xf32>
    %58 = vector.extract_strided_slice %0 {offsets = [3, 0], sizes = [1, 128], strides = [1, 1]} : vector<9x128xf32> to vector<1x128xf32>
    %59 = vector.shape_cast %58 : vector<1x128xf32> to vector<128xf32>
    %60 = vector.shape_cast %59 : vector<128xf32> to vector<1x1x128xf32>
    %61 = vector.broadcast %60 : vector<1x1x128xf32> to vector<16x8x128xf32>
    %62 = arith.mulf %57, %61 : vector<16x8x128xf32>
    %63 = vector.extract_strided_slice %27 {offsets = [1, 0, 0], sizes = [16, 8, 128], strides = [1, 1, 1]} : vector<18x8x128xf32> to vector<16x8x128xf32>
    %64 = vector.extract_strided_slice %0 {offsets = [4, 0], sizes = [1, 128], strides = [1, 1]} : vector<9x128xf32> to vector<1x128xf32>
    %65 = vector.shape_cast %64 : vector<1x128xf32> to vector<128xf32>
    %66 = vector.shape_cast %65 : vector<128xf32> to vector<1x1x128xf32>
    %67 = vector.broadcast %66 : vector<1x1x128xf32> to vector<16x8x128xf32>
    %68 = arith.mulf %63, %67 : vector<16x8x128xf32>
    %69 = arith.addf %62, %68 : vector<16x8x128xf32>
    %70 = vector.extract_strided_slice %36 {offsets = [1, 0, 0], sizes = [16, 8, 128], strides = [1, 1, 1]} : vector<18x8x128xf32> to vector<16x8x128xf32>
    %71 = vector.extract_strided_slice %0 {offsets = [5, 0], sizes = [1, 128], strides = [1, 1]} : vector<9x128xf32> to vector<1x128xf32>
    %72 = vector.shape_cast %71 : vector<1x128xf32> to vector<128xf32>
    %73 = vector.shape_cast %72 : vector<128xf32> to vector<1x1x128xf32>
    %74 = vector.broadcast %73 : vector<1x1x128xf32> to vector<16x8x128xf32>
    %75 = arith.mulf %70, %74 : vector<16x8x128xf32>
    %76 = arith.addf %69, %75 : vector<16x8x128xf32>
    %77 = vector.extract_strided_slice %18 {offsets = [2, 0, 0], sizes = [16, 8, 128], strides = [1, 1, 1]} : vector<18x8x128xf32> to vector<16x8x128xf32>
    %78 = vector.extract_strided_slice %0 {offsets = [6, 0], sizes = [1, 128], strides = [1, 1]} : vector<9x128xf32> to vector<1x128xf32>
    %79 = vector.shape_cast %78 : vector<1x128xf32> to vector<128xf32>
    %80 = vector.shape_cast %79 : vector<128xf32> to vector<1x1x128xf32>
    %81 = vector.broadcast %80 : vector<1x1x128xf32> to vector<16x8x128xf32>
    %82 = arith.mulf %77, %81 : vector<16x8x128xf32>
    %83 = vector.extract_strided_slice %27 {offsets = [2, 0, 0], sizes = [16, 8, 128], strides = [1, 1, 1]} : vector<18x8x128xf32> to vector<16x8x128xf32>
    %84 = vector.extract_strided_slice %0 {offsets = [7, 0], sizes = [1, 128], strides = [1, 1]} : vector<9x128xf32> to vector<1x128xf32>
    %85 = vector.shape_cast %84 : vector<1x128xf32> to vector<128xf32>
    %86 = vector.shape_cast %85 : vector<128xf32> to vector<1x1x128xf32>
    %87 = vector.broadcast %86 : vector<1x1x128xf32> to vector<16x8x128xf32>
    %88 = arith.mulf %83, %87 : vector<16x8x128xf32>
    %89 = arith.addf %82, %88 : vector<16x8x128xf32>
    %90 = vector.extract_strided_slice %36 {offsets = [2, 0, 0], sizes = [16, 8, 128], strides = [1, 1, 1]} : vector<18x8x128xf32> to vector<16x8x128xf32>
    %91 = vector.extract_strided_slice %0 {offsets = [8, 0], sizes = [1, 128], strides = [1, 1]} : vector<9x128xf32> to vector<1x128xf32>
    %92 = vector.shape_cast %91 : vector<1x128xf32> to vector<128xf32>
    %93 = vector.shape_cast %92 : vector<128xf32> to vector<1x1x128xf32>
    %94 = vector.broadcast %93 : vector<1x1x128xf32> to vector<16x8x128xf32>
    %95 = arith.mulf %90, %94 : vector<16x8x128xf32>
    %96 = arith.addf %89, %95 : vector<16x8x128xf32>
    %97 = arith.addf %56, %76 : vector<16x8x128xf32>
    %98 = arith.addf %97, %96 : vector<16x8x128xf32>
    %99 = vector.extract_strided_slice %98 {offsets = [0, 0, 0], sizes = [16, 8, 64], strides = [1, 1, 1]} : vector<16x8x128xf32> to vector<16x8x64xf32>
    %100 = vector.extract_strided_slice %98 {offsets = [0, 0, 64], sizes = [16, 8, 64], strides = [1, 1, 1]} : vector<16x8x128xf32> to vector<16x8x64xf32>
    %101 = arith.maximumf %99, %100 : vector<16x8x64xf32>
    %102 = vector.shape_cast %101 : vector<16x8x64xf32> to vector<8x2x8x64xf32>
    %103 = vector.extract_strided_slice %102 {offsets = [0, 0, 0, 0], sizes = [8, 1, 8, 64], strides = [1, 1, 1, 1]} : vector<8x2x8x64xf32> to vector<8x1x8x64xf32>
    %104 = vector.shape_cast %103 : vector<8x1x8x64xf32> to vector<8x8x64xf32>
    %105 = vector.extract_strided_slice %102 {offsets = [0, 1, 0, 0], sizes = [8, 1, 8, 64], strides = [1, 1, 1, 1]} : vector<8x2x8x64xf32> to vector<8x1x8x64xf32>
    %106 = vector.shape_cast %105 : vector<8x1x8x64xf32> to vector<8x8x64xf32>
    %107 = arith.maximumf %104, %106 : vector<8x8x64xf32>
    %108 = vector.shape_cast %1 : vector<1x64xf32> to vector<1x1x64xf32>
    %109 = vector.broadcast %108 : vector<1x1x64xf32> to vector<8x8x64xf32>
    %110 = arith.addf %107, %109 : vector<8x8x64xf32>
    %cst = arith.constant 0.000000e+00 : f32
    %111 = vector.broadcast %cst : f32 to vector<8x8x64xf32>
    %112 = arith.maximumf %110, %111 : vector<8x8x64xf32>
    %113 = vector.shape_cast %112 : vector<8x8x64xf32> to vector<64x64xf32>
    %cst_13 = arith.constant dense<0.000000e+00> : vector<64x64xf32>
    %114 = tpu.matmul %2, %113, %cst_13 {dimension_numbers = #tpu.dot_dimension_numbers<[1], [1], [0], [0], [0, 0, 1, 0], [], []>, precision = #tpu.contract_precision<fp32>} : vector<64x64xf32>, vector<64x64xf32>, vector<64x64xf32> -> vector<64x64xf32>
    %c0_14 = arith.constant 0 : index
    %c0_15 = arith.constant 0 : index
    %c0_16 = arith.constant 0 : index
    %115 = vector.load %arg7[%c0_14, %c0_15, %c0_16] : memref<1x64x64xf32, #tpu.memory_space<vmem>>, vector<1x64x64xf32>
    %116 = vector.shape_cast %115 : vector<1x64x64xf32> to vector<64x64xf32>
    %117 = vector.shape_cast %114 : vector<64x64xf32> to vector<1x64x64xf32>
    tpu.vector_store %arg7[%c0_14, %c0_15, %c0_16], %117 {strides = array<i32>} : memref<1x64x64xf32, #tpu.memory_space<vmem>>, vector<1x64x64xf32>,
    return
  }
  func.func @transform_0(%arg0: i32, %arg1: i32) -> (i32, i32, i32, i32) {
    %c0_i32 = arith.constant 0 : i32
    %c0_i32_0 = arith.constant 0 : i32
    %c0_i32_1 = arith.constant 0 : i32
    return %arg0, %arg1, %c0_i32, %c0_i32_0 : i32, i32, i32, i32
  }
  func.func @transform_1(%arg0: i32, %arg1: i32) -> (i32, i32, i32, i32) {
    %c0_i32 = arith.constant 0 : i32
    %c0_i32_0 = arith.constant 0 : i32
    %c0_i32_1 = arith.constant 0 : i32
    return %arg0, %arg1, %c0_i32, %c0_i32_0 : i32, i32, i32, i32
  }
  func.func @transform_2(%arg0: i32, %arg1: i32) -> (i32, i32) {
    %c0_i32 = arith.constant 0 : i32
    %c0_i32_0 = arith.constant 0 : i32
    %c0_i32_1 = arith.constant 0 : i32
    return %c0_i32, %c0_i32_0 : i32, i32
  }
  func.func @transform_3(%arg0: i32, %arg1: i32) -> (i32, i32) {
    %c0_i32 = arith.constant 0 : i32
    %c0_i32_0 = arith.constant 0 : i32
    %c0_i32_1 = arith.constant 0 : i32
    return %c0_i32, %c0_i32_0 : i32, i32
  }
  func.func @transform_4(%arg0: i32, %arg1: i32) -> (i32, i32) {
    %c0_i32 = arith.constant 0 : i32
    %c0_i32_0 = arith.constant 0 : i32
    %c0_i32_1 = arith.constant 0 : i32
    return %c0_i32, %c0_i32_0 : i32, i32
  }
  func.func @transform_5(%arg0: i32, %arg1: i32) -> (i32, i32, i32) {
    %c0_i32 = arith.constant 0 : i32
    %c0_i32_0 = arith.constant 0 : i32
    return %arg0, %c0_i32, %arg1 : i32, i32, i32
  }
}

</mosaic_0001>

<bundles_post_ra>
// kernel: tpu_custom_call.1
= control target key start
LH: loop header
LB: loop body
LE: loop exit
PB: predicated region body
PF: predicated region fallthrough
CT: control target
= control target key end

     0   :  { %10 = vsyncpa [#allocation3], 0  ;;  %s3627_s0 = inlined_call_operand.vmem [shape: f32[2,1,18,9], index: 0, kind: input, shape index: {}]   ;;  %s3628_s1 = inlined_call_operand.vmem [shape: f32[2,1,18,9], index: 1, kind: input, shape index: {}]   ;;  %s3629_s2 = inlined_call_operand.vmem [shape: f32[9,128], index: 2, kind: input, shape index: {}]   ;;  %s3630_s3 = inlined_call_operand.vmem [shape: f32[1,64], index: 3, kind: input, shape index: {}]   ;;  %s3631_s4 = inlined_call_operand.vmem [shape: f32[64,64], index: 4, kind: input, shape index: {}]   ;;  %s3632_s5 = inlined_call_operand.hbm [shape: f32[2,64,64], index: 5, kind: output, shape index: {}]  }
   0x1   :  { %12 = vsyncpa [#allocation3 + $0x1], 0  ;;  %s2774_s18 = smov 0   ;;  %s2776_s19 = smov 0  }
   0x2   :  { %s2778_s20 = smov 0   ;;  %s2780_s21 = smov 0  }
   0x3   :  { %s2782_s22 = smov 0   ;;  %s2784_s23 = smov 0  }
   0x4 LB: > { %s2185_s24 = sadd.s32 4294967295, %s2738_s23   ;;  %s2186_s25 = sadd.s32 4294967294, %s2738_s23   ;;  %s2738_s23 = sphi %s2784_s23, %s18_s23   ;;  %s2734_s22 = sphi %s2782_s22, %s3639_s22   ;;  %s2730_s21 = sphi %s2780_s21, %s3638_s21   ;;  %s2726_s20 = sphi %s2778_s20, %s3637_s20   ;;  %s2722_s19 = sphi %s2776_s19, %s3636_s19   ;;  %s2718_s18 = sphi %s2774_s18, %s3635_s18  }
   0x5   : > { %s30_s26 = sadd.s32 1, %s2734_s22  ;;  %s158_s27 = sadd.s32 1, %s2726_s20 }
   0x6   : > { %p32_p0 = scmp.ge.s32.totalorder %s30_s26, 2  ;;  %p168_p1 = scmp.ne.s32.totalorder %s2726_s20, %s2722_s19 }
   0x7   : > { %p169_p2 = scmp.eq.s32.totalorder %s2185_s24, 1  ;;  %p174_p3 = scmp.ne.s32.totalorder %s2722_s19, %s2718_s18 }
   0x8   : > { %s3641_s26 = smov (%p32_p0, %s30_s26), 0  ;;  %p175_p5 = scmp.eq.s32.totalorder %s2186_s25, 1 }
   0x9   : > { %p2814_p4 = por %p169_p2, %p168_p1  ;;  %s153_s29 = ssub.s32 %s2734_s22, %s3641_s26 }
   0xa   : > { %p2189_p6 = scmp.ge.s32.totalorder %s2738_s23, 1  ;;  %p156_p7 = scmp.eq.s32.totalorder %s153_s29, 0 }
   0xb   : > { %p2821_p8 = por %p175_p5, %p174_p3  ;;  %p226_p9 = scmp.lt.s32.totalorder %s2738_s23, 3 }
   0xc   : > { %s2827_s6 = scalar_select %p156_p7, %s2726_s20, %s158_s27  }
   0xd   : > { %p227_p10 = pnand %p2189_p6, %p226_p9 }
   0xe   : > { %p267_p11 = scmp.lt.s32.totalorder (!%p227_p10), %s2730_s21, 1  ;;  %v296_v0 = vlaneseq (!%p227_p10)  ;;  %s2740_s25 = smov (!%p227_p10), 64   ;;  %vm1173_vm1 = vcmask (!%p227_p10), 523264  }
   0xf   : > { %230 = sbr.rel (%p227_p10) target bundleno = 736 (0x2e0), region = 40  ;;  %s2741_s17 = smov (!%p227_p10), [#allocation2]  }
  0x10   : > { %v306_v1 = vshrl.u32 (!%p227_p10), %v296_v0, 7  ;;  %v2925_v62 = vand.u32 (!%p227_p10), 127, %v296_v0  ;;  %s2664_s24 = sshll.u32 (!%p227_p10), %s2741_s17, 4  ;;  %s2665_s24 = int_to_ptr.vmem [resolvable:$false] %s2664_s24 }
  0x12   : > { %v2832_v2 = vsub.s32 (!%p227_p10), 2, %v306_v1  ;;  %v2834_v3 = vsub.s32 (!%p227_p10), 0, %v306_v1  ;;  %v2841_v4 = vsub.s32 (!%p227_p10), 3, %v306_v1  ;;  %v2843_v5 = vsub.s32 (!%p227_p10), 1, %v306_v1 }
  0x13   : > { %v2853_v11 = vsub.s32 (!%p227_p10), 4, %v306_v1  ;;  %v2858_v17 = vsub.s32 (!%p227_p10), 7, %v306_v1  ;;  %v2882_v28 = vsub.s32 (!%p227_p10), 5, %v306_v1  ;;  %v2886_v31 = vsub.s32 (!%p227_p10), 6, %v306_v1 }
  0x14   : > { %vm298_vm0 = vcmp.lt.s32.totalorder (!%p227_p10), %v2925_v62, 64 }
  0x16   : > { %s268_s7 = scalar_select %p267_p11, %s2730_s21, 1 }
  0x18   : > { %s2601_s8 = smul.u32 24, %s268_s7 }
  0x1a   : > { %s2839_s11 = scalar_lea.vmem %s3627_s0, %s2601_s8  ;;  %s284_s14 = scalar_lea.vmem %s3628_s1, %s2601_s8 }
  0x1b   : > { %v299_v6 = vld [vmem:[%s2839_s11] sm:$0xff]  ;;  %v301_v13 = vld [vmem:[%s2839_s11 + $0x10] sm:$0x3]  ;;  %v2860_v18 = vld [vmem:[%s284_s14 + $0x8] sm:$0xff]  ;;  %s264_s8 = sand.u32 1, %s2722_s19  }
  0x1c   : > { %v322_v7 = vrot.slane %v299_v6, %v2832_v2  ;;  %v308_v8 = vrot.slane %v299_v6, %v2834_v3  ;;  %v329_v9 = vrot.slane %v299_v6, %v2841_v4  ;;  %v315_v10 = vrot.slane %v299_v6, %v2843_v5  ;;  %v302_v12 = vld [vmem:[%s284_s14] sm:$0xff]  ;;  %v304_v14 = vld [vmem:[%s284_s14 + $0x10] sm:$0x3]  ;;  %v300_v34 = vld [vmem:[%s2839_s11 + $0x8] sm:$0xff]  ;;  %s2190_s9 = sshll.u32 %s264_s8, 6  ;;  %s2200_s11 = sshll.u32 %s2730_s21, 10 }
  0x1d   : > { %v434_v15 = vrot.slane %v302_v12, %v2834_v3  ;;  %v336_v16 = vrot.slane %v299_v6, %v2853_v11  ;;  %v2863_v19 = vrot.slane %v301_v13, %v2834_v3  ;;  %v2866_v20 = vrot.slane %v304_v14, %v2834_v3  ;;  %s266_s10 = scalar_lea.vmem [#allocation2], %s2190_s9  ;;  %s3573_s15 = scalar_lea.hbm %s3632_s5, %s2200_s11 }
  0x1e   : > { %324 = vbcast.lane.b32.xlu1 %v322_v7, 256  ;;  %310 = vbcast.lane.b32.xlu0 %v308_v8, 256  ;;  %v2870_v21 = vrot.slane %v2860_v18, %v2858_v17  ;;  %v2873_v22 = vrot.slane %v301_v13, %v2843_v5  ;;  %v2876_v23 = vrot.slane %v304_v14, %v2843_v5  ;;  %s2083_s12 = sshll.u32 %s266_s10, 4  ;;  %s3581_s21 = scalar_lea.sflag [#allocation3], %s264_s8  ;;  %s3575_s12 = int_to_ptr.vmem [resolvable:$true] %s2083_s12 }
  0x1f   : > { %v448_v24 = vrot.slane %v302_v12, %v2832_v2  ;;  %v441_v25 = vrot.slane %v302_v12, %v2843_v5  ;;  %v462_v26 = vrot.slane %v302_v12, %v2853_v11  ;;  %v455_v27 = vrot.slane %v302_v12, %v2841_v4  ;;  %s2660_s16 = scalar_lea.vmem %s3575_s12, 1024  ;;  %p2667_p1 = scmp.lt.s32.totalorder %s3575_s12, %s2665_s24 }
  0x20   : > { %v343_v29 = vrot.slane %v299_v6, %v2882_v28  ;;  %v469_v30 = vrot.slane %v302_v12, %v2882_v28  ;;  %v357_v32 = vrot.slane %v299_v6, %v2858_v17  ;;  %v350_v33 = vrot.slane %v299_v6, %v2886_v31  ;;  %v285_v6 = vld [vmem:[%s3629_s2] sm:$0xff]  ;;  %p2661_p12 = scmp.ne.s32.totalorder %s3575_s12, %s2660_s16 }
  0x21   : > { %v476_v35 = vrot.slane %v302_v12, %v2886_v31  ;;  %v364_v36 = vrot.slane %v300_v34, %v2834_v3  ;;  %v490_v37 = vrot.slane %v2860_v18, %v2834_v3  ;;  %v483_v38 = vrot.slane %v302_v12, %v2858_v17 }
  0x22   : > { %331 = vbcast.lane.b32.xlu1 %v329_v9, 256  ;;  %317 = vbcast.lane.b32.xlu0 %v315_v10, 256  ;;  %v371_v39 = vrot.slane %v300_v34, %v2843_v5  ;;  %v497_v40 = vrot.slane %v2860_v18, %v2843_v5  ;;  %v385_v41 = vrot.slane %v300_v34, %v2841_v4  ;;  %p2662_p13 = pnand %p2661_p12, %p2814_p4 }
  0x23   : > { %v378_v42 = vrot.slane %v300_v34, %v2832_v2  ;;  %v504_v43 = vrot.slane %v2860_v18, %v2832_v2  ;;  %v392_v44 = vrot.slane %v300_v34, %v2853_v11  ;;  %v518_v45 = vrot.slane %v2860_v18, %v2853_v11 }
  0x24   : > { %v511_v46 = vrot.slane %v2860_v18, %v2841_v4  ;;  %v399_v47 = vrot.slane %v300_v34, %v2882_v28  ;;  %v525_v48 = vrot.slane %v2860_v18, %v2882_v28  ;;  %v413_v49 = vrot.slane %v300_v34, %v2858_v17  ;;  %p2663_p0 = pneg %p2662_p13 }
  0x25   : > { %v406_v50 = vrot.slane %v300_v34, %v2886_v31  ;;  %v532_v51 = vrot.slane %v2860_v18, %v2886_v31  ;;  %v2941_v0 = vrot.slane %v285_v6, %v2841_v4  ;;  %v2952_v14 = vrot.slane %v285_v6, %v2832_v2 }
  0x26   : > { %436 = vbcast.lane.b32.xlu1 %v434_v15, 256  ;;  %338 = vbcast.lane.b32.xlu0 %v336_v16, 256  ;;  %v2958_v4 = vrot.slane %v285_v6, %v2853_v11  ;;  %v2963_v18 = vrot.slane %v285_v6, %v2882_v28 }
  0x2a   : > { %450 = vbcast.lane.b32.xlu1 %v448_v24, 256  ;;  %443 = vbcast.lane.b32.xlu0 %v441_v25, 256 }
  0x2e   : > { %464 = vbcast.lane.b32.xlu1 %v462_v26, 256  ;;  %457 = vbcast.lane.b32.xlu0 %v455_v27, 256 }
  0x32   : > { %581 = vbcast.lane.b32.xlu1 %v315_v10, 257  ;;  %577 = vbcast.lane.b32.xlu0 %v308_v8, 257  ;;  %v2944_v10 = vrot.slane %v285_v6, %v2886_v31 }
  0x36   : > { %589 = vbcast.lane.b32.xlu1 %v329_v9, 257  ;;  %585 = vbcast.lane.b32.xlu0 %v322_v7, 257  ;;  %v2937_v9 = vrot.slane %v285_v6, %v2834_v3  ;;  %v2955_v3 = vrot.slane %v285_v6, %v2843_v5 }
  0x3a   : > { %345 = vbcast.lane.b32.xlu1 %v343_v29, 256  ;;  %593 = vbcast.lane.b32.xlu0 %v336_v16, 257 }
  0x3e   : > { %597 = vbcast.lane.b32.xlu1 %v343_v29, 257  ;;  %471 = vbcast.lane.b32.xlu0 %v469_v30, 256 }
  0x42   : > { %671 = vbcast.lane.b32.xlu1 %v441_v25, 257  ;;  %667 = vbcast.lane.b32.xlu0 %v434_v15, 257 }
  0x46   : > { %679 = vbcast.lane.b32.xlu1 %v455_v27, 257  ;;  %675 = vbcast.lane.b32.xlu0 %v448_v24, 257 }
  0x4a   : > { %687 = vbcast.lane.b32.xlu1 %v469_v30, 257  ;;  %683 = vbcast.lane.b32.xlu0 %v462_v26, 257 }
  0x4e   : > { %359 = vbcast.lane.b32.xlu1 %v357_v32, 256  ;;  %352 = vbcast.lane.b32.xlu0 %v350_v33, 256 }
  0x52   : > { %478 = vbcast.lane.b32.xlu1 %v476_v35, 256  ;;  %366 = vbcast.lane.b32.xlu0 %v364_v36, 256 }
  0x56   : > { %492 = vbcast.lane.b32.xlu1 %v490_v37, 256  ;;  %485 = vbcast.lane.b32.xlu0 %v483_v38, 256 }
  0x5a   : > { %605 = vbcast.lane.b32.xlu1 %v357_v32, 257  ;;  %601 = vbcast.lane.b32.xlu0 %v350_v33, 257 }
  0x5e   : > { %373 = vbcast.lane.b32.xlu1 %v371_v39, 256  ;;  %609 = vbcast.lane.b32.xlu0 %v364_v36, 257 }
  0x62   : > { %613 = vbcast.lane.b32.xlu1 %v371_v39, 257  ;;  %499 = vbcast.lane.b32.xlu0 %v497_v40, 256 }
  0x66   : > { %695 = vbcast.lane.b32.xlu1 %v483_v38, 257  ;;  %691 = vbcast.lane.b32.xlu0 %v476_v35, 257 }
  0x6a   : > { %703 = vbcast.lane.b32.xlu1 %v497_v40, 257  ;;  %699 = vbcast.lane.b32.xlu0 %v490_v37, 257 }
  0x6e   : > { %387 = vbcast.lane.b32.xlu1 %v385_v41, 256  ;;  %380 = vbcast.lane.b32.xlu0 %v378_v42, 256 }
  0x72   : > { %506 = vbcast.lane.b32.xlu1 %v504_v43, 256  ;;  %394 = vbcast.lane.b32.xlu0 %v392_v44, 256 }
  0x76   : > { %520 = vbcast.lane.b32.xlu1 %v518_v45, 256  ;;  %513 = vbcast.lane.b32.xlu0 %v511_v46, 256 }
  0x7a   : > { %621 = vbcast.lane.b32.xlu1 %v385_v41, 257  ;;  %617 = vbcast.lane.b32.xlu0 %v378_v42, 257 }
  0x7e   : > { %401 = vbcast.lane.b32.xlu1 %v399_v47, 256  ;;  %625 = vbcast.lane.b32.xlu0 %v392_v44, 257 }
  0x82   : > { %629 = vbcast.lane.b32.xlu1 %v399_v47, 257  ;;  %527 = vbcast.lane.b32.xlu0 %v525_v48, 256 }
  0x86   : > { %711 = vbcast.lane.b32.xlu1 %v511_v46, 257  ;;  %707 = vbcast.lane.b32.xlu0 %v504_v43, 257 }
  0x8a   : > { %719 = vbcast.lane.b32.xlu1 %v525_v48, 257  ;;  %715 = vbcast.lane.b32.xlu0 %v518_v45, 257 }
  0x8e   : > { %415 = vbcast.lane.b32.xlu1 %v413_v49, 256  ;;  %408 = vbcast.lane.b32.xlu0 %v406_v50, 256 }
  0x90   : > { %v325_v52 = vpop.permute.xlu1 %324  ;;  %v311_v53 = vpop.permute.xlu0 %310 }
  0x92   : > { %534 = vbcast.lane.b32.xlu1 %v532_v51, 256  ;;  %422 = vbcast.lane.b32.xlu0 %v2863_v19, 256 }
  0x94   : > { %v332_v54 = vpop.permute.xlu1 %331  ;;  %v318_v55 = vpop.permute.xlu0 %317 }
  0x96   : > { %548 = vbcast.lane.b32.xlu1 %v2866_v20, 256  ;;  %541 = vbcast.lane.b32.xlu0 %v2870_v21, 256 }
  0x98   : > { %v437_v56 = vpop.permute.xlu1 %436  ;;  %v339_v57 = vpop.permute.xlu0 %338 }
  0x99   : > { %v557_v12 = vsel %vm298_vm0, %v311_v53, %v437_v56 }
  0x9a   : > { %637 = vbcast.lane.b32.xlu1 %v413_v49, 257  ;;  %633 = vbcast.lane.b32.xlu0 %v406_v50, 257  ;;  %v759_v5 = vmul.f32 %v2937_v9, %v557_v12 }
  0x9c   : > { %v451_v58 = vpop.permute.xlu1 %450  ;;  %v444_v59 = vpop.permute.xlu0 %443 }
  0x9d   : > { %v559_v13 = vsel %vm298_vm0, %v325_v52, %v451_v58 }
  0x9e   : > { %429 = vbcast.lane.b32.xlu1 %v2873_v22, 256  ;;  %641 = vbcast.lane.b32.xlu0 %v2863_v19, 257  ;;  %v2966_v19 = vrot.slane %v285_v6, %v2858_v17  ;;  %v761_v11 = vmul.f32 %v2937_v9, %v559_v13  ;;  %v852_v17 = vmul.f32 %v2941_v0, %v559_v13 }
  0xa0   : > { %v2920_v60 = vpop.permute.xlu1 %464  ;;  %v458_v61 = vpop.permute.xlu0 %457 }
  0xa1   : > { %v2984_v24 = vsel %vm298_vm0, %v339_v57, %v2920_v60  ;;  %v560_v25 = vsel %vm298_vm0, %v332_v54, %v458_v61 }
  0xa2   : > { %645 = vbcast.lane.b32.xlu1 %v2873_v22, 257  ;;  %555 = vbcast.lane.b32.xlu0 %v2876_v23, 256  ;;  %v854_v36 = vmul.f32 %v2941_v0, %v2984_v24  ;;  %v945_v37 = vmul.f32 %v2944_v10, %v2984_v24  ;;  %v762_v38 = vmul.f32 %v2937_v9, %v560_v25 }
  0xa3   : > { %v853_v40 = vmul.f32 %v2941_v0, %v560_v25  ;;  %v944_v41 = vmul.f32 %v2944_v10, %v560_v25 }
  0xa4   : > { %v582_v63 = vpop.permute.xlu1 %581  ;;  %v578_v1 = vpop.permute.xlu0 %577 }
  0xa5   : > { %v647_v2 = vsel %vm298_vm0, %v437_v56, %v578_v1 }
  0xa6   : > { %727 = vbcast.lane.b32.xlu1 %v2870_v21, 257  ;;  %723 = vbcast.lane.b32.xlu0 %v532_v51, 257  ;;  %v558_v21 = vsel %vm298_vm0, %v318_v55, %v444_v59  ;;  %v779_v28 = vmul.f32 %v2955_v3, %v647_v2 }
  0xa7   : > { %v760_v32 = vmul.f32 %v2937_v9, %v558_v21  ;;  %v851_v33 = vmul.f32 %v2941_v0, %v558_v21 }
  0xa8   : > { %v2932_v7 = vpop.permute.xlu1 %589  ;;  %v2934_v8 = vpop.permute.xlu0 %585  ;;  %v795_v46 = vadd.f32 %v779_v28, %v759_v5 }
  0xa9   : > { %v650_v22 = vsel %vm298_vm0, %v458_v61, %v2932_v7  ;;  %v649_v29 = vsel %vm298_vm0, %v451_v58, %v2934_v8 }
  0xaa   : > { %735 = vbcast.lane.b32.xlu1 %v2876_v23, 257  ;;  %731 = vbcast.lane.b32.xlu0 %v2866_v20, 257  ;;  %v648_v20 = vsel %vm298_vm0, %v444_v59, %v582_v63  ;;  %v943_v23 = vmul.f32 %v2944_v10, %v559_v13  ;;  %v782_v34 = vmul.f32 %v2955_v3, %v650_v22 }
  0xab   : > { %v780_v26 = vmul.f32 %v2955_v3, %v648_v20  ;;  %v871_v27 = vmul.f32 %v2958_v4, %v648_v20  ;;  %v873_v35 = vmul.f32 %v2958_v4, %v650_v22  ;;  %v964_v39 = vmul.f32 %v2966_v19, %v650_v22 }
  0xac   : > { %v346_v15 = vpop.permute.xlu1 %345  ;;  %v2960_v16 = vpop.permute.xlu0 %593  ;;  %v781_v42 = vmul.f32 %v2955_v3, %v649_v29  ;;  %v872_v43 = vmul.f32 %v2958_v4, %v649_v29  ;;  %v963_v47 = vmul.f32 %v2966_v19, %v649_v29  ;;  %v798_v50 = vadd.f32 %v782_v34, %v762_v38 }
  0xad   : > { %v796_v44 = vadd.f32 %v780_v26, %v760_v32  ;;  %v887_v45 = vadd.f32 %v871_v27, %v851_v33  ;;  %v889_v51 = vadd.f32 %v873_v35, %v853_v40  ;;  %v980_v54 = vadd.f32 %v964_v39, %v944_v41 }
  0xae   : > { %v3017_v55 = vsel %vm298_vm0, %v2920_v60, %v2960_v16  ;;  %v797_v58 = vadd.f32 %v781_v42, %v761_v11  ;;  %v888_v59 = vadd.f32 %v872_v43, %v852_v17  ;;  %v979_v6 = vadd.f32 %v963_v47, %v943_v23 }
  0xaf   : > { %v965_v5 = vmul.f32 %v2966_v19, %v3017_v55 }
  0xb0   : > { %v598_v30 = vpop.permute.xlu1 %597  ;;  %v472_v31 = vpop.permute.xlu0 %471 }
  0xb1   : > { %v3023_v61 = vsel %vm298_vm0, %v346_v15, %v472_v31  ;;  %v3033_v60 = vsel %vm298_vm0, %v472_v31, %v598_v30  ;;  %v874_v15 = vmul.f32 %v2958_v4, %v3017_v55  ;;  %v981_v42 = vadd.f32 %v965_v5, %v945_v37 }
  0xb2   : > { %v946_v22 = vmul.f32 %v2944_v10, %v3023_v61  ;;  %v966_v26 = vmul.f32 %v2966_v19, %v3033_v60 }
  0xb3   : > { %v890_v41 = vadd.f32 %v874_v15, %v854_v36 }
  0xb4   : > { %v672_v48 = vpop.permute.xlu1 %671  ;;  %v668_v49 = vpop.permute.xlu0 %667 }
  0xb5   : > { %v738_v52 = vsel %vm298_vm0, %v582_v63, %v672_v48  ;;  %v737_v53 = vsel %vm298_vm0, %v578_v1, %v668_v49  ;;  %v3029_v1 = vld [vmem:[%s3629_s2 + $0x8] ss:$0 sm:$0xff]  ;;  %v982_v49 = vadd.f32 %v966_v26, %v946_v22  ;;  %v764_v22 = vmul.f32 %v2937_v9, %v3023_v61 }
  0xb6   : > { %v907_v56 = vmul.f32 %v2963_v18, %v738_v52  ;;  %v815_v57 = vmul.f32 %v2952_v14, %v737_v53  ;;  %v816_v63 = vmul.f32 %v2952_v14, %v738_v52 }
  0xb8   : > { %v923_v12 = vadd.f32 %v907_v56, %v887_v45  ;;  %v831_v13 = vadd.f32 %v815_v57, %v795_v46  ;;  %v680_v20 = vpop.permute.xlu1 %679  ;;  %v676_v2 = vpop.permute.xlu0 %675  ;;  %v832_v27 = vadd.f32 %v816_v63, %v796_v44 }
  0xb9   : > { %v740_v11 = vsel %vm298_vm0, %v2932_v7, %v680_v20  ;;  %v739_v21 = vsel %vm298_vm0, %v2934_v8, %v676_v2  ;;  %v875_v20 = vmul.f32 %v2958_v4, %v3033_v60  ;;  %v763_v2 = vmul.f32 %v2937_v9, %v2984_v24 }
  0xba   : > { %v909_v17 = vmul.f32 %v2963_v18, %v740_v11  ;;  %v1000_v23 = vmul.f32 %v3029_v1, %v740_v11  ;;  %v817_v25 = vmul.f32 %v2952_v14, %v739_v21  ;;  %v908_v28 = vmul.f32 %v2963_v18, %v739_v21 }
  0xbb   : > { %v999_v7 = vmul.f32 %v3029_v1, %v739_v21  ;;  %v818_v29 = vmul.f32 %v2952_v14, %v740_v11  ;;  %v1031_v34 = vadd.f32 %v923_v12, %v831_v13  ;;  %v783_v12 = vmul.f32 %v2955_v3, %v3017_v55 }
  0xbc   : > { %v925_v8 = vadd.f32 %v909_v17, %v889_v51  ;;  %v833_v31 = vadd.f32 %v817_v25, %v797_v58  ;;  %v688_v32 = vpop.permute.xlu1 %687  ;;  %v684_v33 = vpop.permute.xlu0 %683  ;;  %v924_v35 = vadd.f32 %v908_v28, %v888_v59  ;;  %v1016_v44 = vadd.f32 %v1000_v23, %v980_v54 }
  0xbd   : > { %v742_v38 = vsel %vm298_vm0, %v598_v30, %v688_v32  ;;  %v741_v39 = vsel %vm298_vm0, %v2960_v16, %v684_v33  ;;  %v1015_v40 = vadd.f32 %v999_v7, %v979_v6  ;;  %v834_v51 = vadd.f32 %v818_v29, %v798_v50 }
  0xbe   : > { %v1002_v43 = vmul.f32 %v3029_v1, %v742_v38  ;;  %v910_v45 = vmul.f32 %v2963_v18, %v741_v39  ;;  %v1001_v46 = vmul.f32 %v3029_v1, %v741_v39  ;;  %v1032_v48 = vadd.f32 %v924_v35, %v832_v27 }
  0xbf   : > { %v3063_v47 = vadd.f32 %v1031_v34, %v1015_v40  ;;  %v1033_v37 = vadd.f32 %v925_v8, %v833_v31  ;;  %v855_v13 = vmul.f32 %v2941_v0, %v3023_v61  ;;  %v911_v15 = vmul.f32 %v2963_v18, %v742_v38 }
  0xc0   : > { %v360_v30 = vpop.permute.xlu1 %359  ;;  %v353_v52 = vpop.permute.xlu0 %352  ;;  %v926_v53 = vadd.f32 %v910_v45, %v890_v41  ;;  %v3067_v16 = vadd.f32 %v1032_v48, %v1016_v44  ;;  %v1017_v36 = vadd.f32 %v1001_v46, %v981_v42  ;;  %v1018_v56 = vadd.f32 %v1002_v43, %v982_v49 }
  0xc1   : > { %1079 = vrot.lane.b32.xlu0 %v3063_v47, %s2740_s25  ;;  %v819_v5 = vmul.f32 %v2952_v14, %v741_v39  ;;  %v784_v55 = vmul.f32 %v2955_v3, %v3033_v60  ;;  %v799_v17 = vadd.f32 %v783_v12, %v763_v2  ;;  %v891_v23 = vadd.f32 %v875_v20, %v855_v13 }
  0xc2   : > { %1081 = vrot.lane.b32.xlu1 %v3067_v16, %s2740_s25  ;;  %v3071_v54 = vadd.f32 %v1033_v37, %v1017_v36  ;;  %v1034_v57 = vadd.f32 %v926_v53, %v834_v51  ;;  %v820_v25 = vmul.f32 %v2952_v14, %v742_v38 }
  0xc3   : > { %v927_v26 = vadd.f32 %v911_v15, %v891_v23  ;;  %v835_v27 = vadd.f32 %v819_v5, %v799_v17  ;;  %v800_v29 = vadd.f32 %v784_v55, %v764_v22 }
  0xc4   : > { %v479_v58 = vpop.permute.xlu1 %478  ;;  %v367_v50 = vpop.permute.xlu0 %366  ;;  %v3075_v59 = vadd.f32 %v1034_v57, %v1018_v56 }
  0xc5   : > { %1083 = vrot.lane.b32.xlu0 %v3071_v54, %s2740_s25  ;;  %v563_v61 = vsel %vm298_vm0, %v353_v52, %v479_v58  ;;  %v836_v31 = vadd.f32 %v820_v25, %v800_v29  ;;  %v1035_v42 = vadd.f32 %v927_v26, %v835_v27 }
  0xc6   : > { %1085 = vrot.lane.b32.xlu1 %v3075_v59, %s2740_s25  ;;  %v765_v43 = vmul.f32 %v2937_v9, %v563_v61  ;;  %v856_v44 = vmul.f32 %v2941_v0, %v563_v61  ;;  %v947_v48 = vmul.f32 %v2944_v10, %v563_v61 }
  0xc8   : > { %v493_v63 = vpop.permute.xlu1 %492  ;;  %v486_v6 = vpop.permute.xlu0 %485 }
  0xc9   : > { %v564_v60 = vsel %vm298_vm0, %v360_v30, %v486_v6  ;;  %v3104_v32 = vsel %vm298_vm0, %v367_v50, %v493_v63 }
  0xca   : > { %v766_v45 = vmul.f32 %v2937_v9, %v564_v60  ;;  %v857_v46 = vmul.f32 %v2941_v0, %v564_v60  ;;  %v858_v49 = vmul.f32 %v2941_v0, %v3104_v32  ;;  %v948_v51 = vmul.f32 %v2944_v10, %v564_v60 }
  0xcb   : > { %v949_v52 = vmul.f32 %v2944_v10, %v3104_v32 }
  0xcc   : > { %v606_v11 = vpop.permute.xlu1 %605  ;;  %v602_v21 = vpop.permute.xlu0 %601 }
  0xcd   : > { %v654_v24 = vsel %vm298_vm0, %v486_v6, %v606_v11  ;;  %v653_v8 = vsel %vm298_vm0, %v479_v58, %v602_v21 }
  0xce   : > { %v786_v33 = vmul.f32 %v2955_v3, %v654_v24  ;;  %v877_v34 = vmul.f32 %v2958_v4, %v654_v24  ;;  %v968_v35 = vmul.f32 %v2966_v19, %v654_v24  ;;  %v785_v38 = vmul.f32 %v2955_v3, %v653_v8 }
  0xcf   : > { %v876_v39 = vmul.f32 %v2958_v4, %v653_v8  ;;  %v967_v37 = vmul.f32 %v2966_v19, %v653_v8 }
  0xd0   : > { %v374_v28 = vpop.permute.xlu1 %373  ;;  %v610_v7 = vpop.permute.xlu0 %609  ;;  %v802_v53 = vadd.f32 %v786_v33, %v766_v45  ;;  %v893_v36 = vadd.f32 %v877_v34, %v857_v46  ;;  %v984_v56 = vadd.f32 %v968_v35, %v948_v51  ;;  %v801_v57 = vadd.f32 %v785_v38, %v765_v43 }
  0xd1   : > { %v655_v30 = vsel %vm298_vm0, %v493_v63, %v610_v7  ;;  %v892_v58 = vadd.f32 %v876_v39, %v856_v44  ;;  %v983_v17 = vadd.f32 %v967_v37, %v947_v48 }
  0xd2   : > { %v878_v13 = vmul.f32 %v2958_v4, %v655_v30  ;;  %v969_v15 = vmul.f32 %v2966_v19, %v655_v30 }
  0xd4   : > { %v614_v40 = vpop.permute.xlu1 %613  ;;  %v500_v41 = vpop.permute.xlu0 %499  ;;  %v894_v34 = vadd.f32 %v878_v13, %v858_v49  ;;  %v985_v35 = vadd.f32 %v969_v15, %v949_v52 }
  0xd5   : > { %v566_v50 = vsel %vm298_vm0, %v374_v28, %v500_v41  ;;  %v656_v63 = vsel %vm298_vm0, %v500_v41, %v614_v40 }
  0xd6   : > { %v950_v23 = vmul.f32 %v2944_v10, %v566_v50  ;;  %v859_v13 = vmul.f32 %v2941_v0, %v566_v50 }
  0xd8   : > { %v696_v6 = vpop.permute.xlu1 %695  ;;  %v692_v12 = vpop.permute.xlu0 %691 }
  0xd9   : > { %v744_v20 = vsel %vm298_vm0, %v606_v11, %v696_v6  ;;  %v743_v2 = vsel %vm298_vm0, %v602_v21, %v692_v12  ;;  %v970_v11 = vmul.f32 %v2966_v19, %v656_v63  ;;  %v787_v12 = vmul.f32 %v2955_v3, %v655_v30 }
  0xda   : > { %v913_v5 = vmul.f32 %v2963_v18, %v744_v20  ;;  %v1004_v22 = vmul.f32 %v3029_v1, %v744_v20  ;;  %v821_v55 = vmul.f32 %v2952_v14, %v743_v2  ;;  %v912_v25 = vmul.f32 %v2963_v18, %v743_v2 }
  0xdb   : > { %v1003_v26 = vmul.f32 %v3029_v1, %v743_v2  ;;  %v822_v27 = vmul.f32 %v2952_v14, %v744_v20  ;;  %v986_v46 = vadd.f32 %v970_v11, %v950_v23  ;;  %v879_v20 = vmul.f32 %v2958_v4, %v656_v63 }
  0xdc   : > { %v929_v21 = vadd.f32 %v913_v5, %v893_v36  ;;  %v837_v24 = vadd.f32 %v821_v55, %v801_v57  ;;  %v704_v28 = vpop.permute.xlu1 %703  ;;  %v700_v29 = vpop.permute.xlu0 %699  ;;  %v928_v8 = vadd.f32 %v912_v25, %v892_v58  ;;  %v1020_v39 = vadd.f32 %v1004_v22, %v984_v56 }
  0xdd   : > { %v746_v61 = vsel %vm298_vm0, %v614_v40, %v704_v28  ;;  %v745_v60 = vsel %vm298_vm0, %v610_v7, %v700_v29  ;;  %v1019_v33 = vadd.f32 %v1003_v26, %v983_v17  ;;  %v838_v48 = vadd.f32 %v822_v27, %v802_v53 }
  0xde   : > { %v1006_v38 = vmul.f32 %v3029_v1, %v746_v61  ;;  %v914_v41 = vmul.f32 %v2963_v18, %v745_v60  ;;  %v1005_v43 = vmul.f32 %v3029_v1, %v745_v60  ;;  %v1036_v45 = vadd.f32 %v928_v8, %v836_v31 }
  0xdf   : > { %v3149_v44 = vadd.f32 %v1035_v42, %v1019_v33  ;;  %v1037_v52 = vadd.f32 %v929_v21, %v837_v24  ;;  %v767_v2 = vmul.f32 %v2937_v9, %v3104_v32  ;;  %v915_v15 = vmul.f32 %v2963_v18, %v746_v61 }
  0xe0   : > { %v388_v51 = vpop.permute.xlu1 %387  ;;  %v381_v40 = vpop.permute.xlu0 %380  ;;  %v930_v36 = vadd.f32 %v914_v41, %v894_v34  ;;  %v3153_v7 = vadd.f32 %v1036_v45, %v1020_v39  ;;  %v1021_v49 = vadd.f32 %v1005_v43, %v985_v35  ;;  %v1022_v42 = vadd.f32 %v1006_v38, %v986_v46 }
  0xe1   : > { %1087 = vrot.lane.b32.xlu0 %v3149_v44, %s2740_s25  ;;  %v823_v5 = vmul.f32 %v2952_v14, %v745_v60  ;;  %v768_v17 = vmul.f32 %v2937_v9, %v566_v50  ;;  %v788_v23 = vmul.f32 %v2955_v3, %v656_v63  ;;  %v803_v25 = vadd.f32 %v787_v12, %v767_v2 }
  0xe2   : > { %1089 = vrot.lane.b32.xlu1 %v3153_v7, %s2740_s25  ;;  %v3157_v37 = vadd.f32 %v1037_v52, %v1021_v49  ;;  %v1038_v56 = vadd.f32 %v930_v36, %v838_v48  ;;  %v895_v26 = vadd.f32 %v879_v20, %v859_v13  ;;  %v824_v30 = vmul.f32 %v2952_v14, %v746_v61 }
  0xe3   : > { %v839_v27 = vadd.f32 %v823_v5, %v803_v25  ;;  %v804_v28 = vadd.f32 %v788_v23, %v768_v17 }
  0xe4   : > { %v507_v31 = vpop.permute.xlu1 %506  ;;  %v395_v57 = vpop.permute.xlu0 %394  ;;  %v3161_v53 = vadd.f32 %v1038_v56, %v1022_v42  ;;  %v931_v11 = vadd.f32 %v915_v15, %v895_v26 }
  0xe5   : > { %1091 = vrot.lane.b32.xlu0 %v3157_v37, %s2740_s25  ;;  %v567_v50 = vsel %vm298_vm0, %v381_v40, %v507_v31  ;;  %v840_v8 = vadd.f32 %v824_v30, %v804_v28 }
  0xe6   : > { %1093 = vrot.lane.b32.xlu1 %v3161_v53, %s2740_s25  ;;  %v1039_v43 = vadd.f32 %v931_v11, %v839_v27  ;;  %v769_v45 = vmul.f32 %v2937_v9, %v567_v50  ;;  %v860_v46 = vmul.f32 %v2941_v0, %v567_v50  ;;  %v951_v40 = vmul.f32 %v2944_v10, %v567_v50 }
  0xe8   : > { %v521_v58 = vpop.permute.xlu1 %520  ;;  %v514_v6 = vpop.permute.xlu0 %513 }
  0xe9   : > { %v568_v63 = vsel %vm298_vm0, %v388_v51, %v514_v6  ;;  %v3185_v61 = vsel %vm298_vm0, %v395_v57, %v521_v58 }
  0xea   : > { %v770_v48 = vmul.f32 %v2937_v9, %v568_v63  ;;  %v861_v51 = vmul.f32 %v2941_v0, %v568_v63  ;;  %v862_v36 = vmul.f32 %v2941_v0, %v3185_v61  ;;  %v952_v49 = vmul.f32 %v2944_v10, %v568_v63 }
  0xeb   : > { %v953_v42 = vmul.f32 %v2944_v10, %v3185_v61 }
  0xec   : > { %v622_v22 = vpop.permute.xlu1 %621  ;;  %v618_v55 = vpop.permute.xlu0 %617 }
  0xed   : > { %v658_v21 = vsel %vm298_vm0, %v514_v6, %v622_v22  ;;  %v657_v29 = vsel %vm298_vm0, %v507_v31, %v618_v55 }
  0xee   : > { %v790_v60 = vmul.f32 %v2955_v3, %v658_v21  ;;  %v881_v33 = vmul.f32 %v2958_v4, %v658_v21  ;;  %v972_v34 = vmul.f32 %v2966_v19, %v658_v21  ;;  %v789_v35 = vmul.f32 %v2955_v3, %v657_v29 }
  0xef   : > { %v880_v38 = vmul.f32 %v2958_v4, %v657_v29  ;;  %v971_v57 = vmul.f32 %v2966_v19, %v657_v29 }
  0xf0   : > { %v402_v32 = vpop.permute.xlu1 %401  ;;  %v626_v24 = vpop.permute.xlu0 %625  ;;  %v806_v56 = vadd.f32 %v790_v60, %v770_v48  ;;  %v897_v31 = vadd.f32 %v881_v33, %v861_v51  ;;  %v988_v6 = vadd.f32 %v972_v34, %v952_v49  ;;  %v805_v12 = vadd.f32 %v789_v35, %v769_v45 }
  0xf1   : > { %v659_v52 = vsel %vm298_vm0, %v521_v58, %v626_v24  ;;  %v896_v13 = vadd.f32 %v880_v38, %v860_v46  ;;  %v987_v27 = vadd.f32 %v971_v57, %v951_v40 }
  0xf2   : > { %v882_v5 = vmul.f32 %v2958_v4, %v659_v52  ;;  %v973_v25 = vmul.f32 %v2966_v19, %v659_v52 }
  0xf4   : > { %v630_v39 = vpop.permute.xlu1 %629  ;;  %v528_v41 = vpop.permute.xlu0 %527  ;;  %v989_v45 = vadd.f32 %v973_v25, %v953_v42  ;;  %v791_v25 = vmul.f32 %v2955_v3, %v659_v52 }
  0xf5   : > { %v570_v20 = vsel %vm298_vm0, %v402_v32, %v528_v41  ;;  %v660_v58 = vsel %vm298_vm0, %v528_v41, %v630_v39  ;;  %v898_v41 = vadd.f32 %v882_v5, %v862_v36 }
  0xf6   : > { %v954_v21 = vmul.f32 %v2944_v10, %v570_v20 }
  0xf8   : > { %v712_v2 = vpop.permute.xlu1 %711  ;;  %v708_v15 = vpop.permute.xlu0 %707 }
  0xf9   : > { %v748_v17 = vsel %vm298_vm0, %v622_v22, %v712_v2  ;;  %v747_v23 = vsel %vm298_vm0, %v618_v55, %v708_v15  ;;  %v974_v22 = vmul.f32 %v2966_v19, %v660_v58 }
  0xfa   : > { %v917_v26 = vmul.f32 %v2963_v18, %v748_v17  ;;  %v1008_v30 = vmul.f32 %v3029_v1, %v748_v17  ;;  %v825_v11 = vmul.f32 %v2952_v14, %v747_v23  ;;  %v916_v32 = vmul.f32 %v2963_v18, %v747_v23 }
  0xfb   : > { %v1007_v28 = vmul.f32 %v3029_v1, %v747_v23  ;;  %v826_v29 = vmul.f32 %v2952_v14, %v748_v17  ;;  %v990_v57 = vadd.f32 %v974_v22, %v954_v21 }
  0xfc   : > { %v933_v55 = vadd.f32 %v917_v26, %v897_v31  ;;  %v841_v50 = vadd.f32 %v825_v11, %v805_v12  ;;  %v720_v63 = vpop.permute.xlu1 %719  ;;  %v716_v60 = vpop.permute.xlu0 %715  ;;  %v932_v33 = vadd.f32 %v916_v32, %v896_v13  ;;  %v1024_v48 = vadd.f32 %v1008_v30, %v988_v6 }
  0xfd   : > { %v750_v34 = vsel %vm298_vm0, %v630_v39, %v720_v63  ;;  %v749_v35 = vsel %vm298_vm0, %v626_v24, %v716_v60  ;;  %v1023_v38 = vadd.f32 %v1007_v28, %v987_v27  ;;  %v842_v12 = vadd.f32 %v826_v29, %v806_v56 }
  0xfe   : > { %v1010_v46 = vmul.f32 %v3029_v1, %v750_v34  ;;  %v918_v51 = vmul.f32 %v2963_v18, %v749_v35  ;;  %v1009_v40 = vmul.f32 %v3029_v1, %v749_v35  ;;  %v1040_v31 = vadd.f32 %v932_v33, %v840_v8 }
  0xff   : > { %v3230_v49 = vadd.f32 %v1039_v43, %v1023_v38  ;;  %v1041_v42 = vadd.f32 %v933_v55, %v841_v50  ;;  %v863_v26 = vmul.f32 %v2941_v0, %v570_v20  ;;  %v883_v30 = vmul.f32 %v2958_v4, %v660_v58 }
 0x100   : > { %v416_v13 = vpop.permute.xlu1 %415  ;;  %v409_v39 = vpop.permute.xlu0 %408  ;;  %v934_v2 = vadd.f32 %v918_v51, %v898_v41  ;;  %v3234_v24 = vadd.f32 %v1040_v31, %v1024_v48  ;;  %v1025_v36 = vadd.f32 %v1009_v40, %v989_v45  ;;  %v1026_v43 = vadd.f32 %v1010_v46, %v990_v57 }
 0x101   : > { %1095 = vrot.lane.b32.xlu0 %v3230_v49, %s2740_s25  ;;  %v771_v11 = vmul.f32 %v2937_v9, %v3185_v61  ;;  %v772_v32 = vmul.f32 %v2937_v9, %v570_v20  ;;  %v792_v28 = vmul.f32 %v2955_v3, %v660_v58  ;;  %v919_v22 = vmul.f32 %v2963_v18, %v750_v34 }
 0x102   : > { %1097 = vrot.lane.b32.xlu1 %v3234_v24, %s2740_s25  ;;  %v3238_v6 = vadd.f32 %v1041_v42, %v1025_v36  ;;  %v1042_v15 = vadd.f32 %v934_v2, %v842_v12  ;;  %v827_v29 = vmul.f32 %v2952_v14, %v749_v35  ;;  %v899_v50 = vadd.f32 %v883_v30, %v863_v26 }
 0x103   : > { %v807_v55 = vadd.f32 %v791_v25, %v771_v11  ;;  %v828_v52 = vmul.f32 %v2952_v14, %v750_v34  ;;  %v808_v33 = vadd.f32 %v792_v28, %v772_v32 }
 0x104   : > { %v535_v8 = vpop.permute.xlu1 %534  ;;  %v423_v5 = vpop.permute.xlu0 %422  ;;  %v3242_v56 = vadd.f32 %v1042_v15, %v1026_v43  ;;  %v935_v61 = vadd.f32 %v919_v22, %v899_v50 }
 0x105   : > { %1099 = vrot.lane.b32.xlu0 %v3238_v6, %s2740_s25  ;;  %v843_v38 = vadd.f32 %v827_v29, %v807_v55  ;;  %v571_v58 = vsel %vm298_vm0, %v409_v39, %v535_v8  ;;  %v844_v45 = vadd.f32 %v828_v52, %v808_v33 }
 0x106   : > { %1101 = vrot.lane.b32.xlu1 %v3242_v56, %s2740_s25  ;;  %v864_v43 = vmul.f32 %v2941_v0, %v571_v58  ;;  %v955_v15 = vmul.f32 %v2944_v10, %v571_v58 }
 0x107   : > { %v1043_v42 = vadd.f32 %v935_v61, %v843_v38 }
 0x108   : > { %v549_v17 = vpop.permute.xlu1 %548  ;;  %v542_v23 = vpop.permute.xlu0 %541 }
 0x109   : > { %v572_v35 = vsel %vm298_vm0, %v416_v13, %v542_v23  ;;  %v573_v34 = vsel %vm298_vm0, %v423_v5, %v549_v17  ;;  %v773_v13 = vmul.f32 %v2937_v9, %v571_v58 }
 0x10a   : > { %v774_v39 = vmul.f32 %v2937_v9, %v572_v35  ;;  %v866_v5 = vmul.f32 %v2941_v0, %v573_v34 }
 0x10c   : > { %v638_v27 = vpop.permute.xlu1 %637  ;;  %v634_v21 = vpop.permute.xlu0 %633 }
 0x10d   : > { %v662_v63 = vsel %vm298_vm0, %v542_v23, %v638_v27  ;;  %v661_v20 = vsel %vm298_vm0, %v535_v8, %v634_v21  ;;  %v956_v8 = vmul.f32 %v2944_v10, %v572_v35 }
 0x10e   : > { %v794_v46 = vmul.f32 %v2955_v3, %v662_v63  ;;  %v885_v48 = vmul.f32 %v2958_v4, %v662_v63  ;;  %v976_v51 = vmul.f32 %v2966_v19, %v662_v63  ;;  %v793_v40 = vmul.f32 %v2955_v3, %v661_v20 }
 0x10f   : > { %v884_v31 = vmul.f32 %v2958_v4, %v661_v20  ;;  %v975_v2 = vmul.f32 %v2966_v19, %v661_v20  ;;  %v865_v3 = vmul.f32 %v2941_v0, %v572_v35 }
 0x110   : > { %v430_v60 = vpop.permute.xlu1 %429  ;;  %v642_v41 = vpop.permute.xlu0 %641  ;;  %v810_v23 = vadd.f32 %v794_v46, %v774_v39  ;;  %v992_v26 = vadd.f32 %v976_v51, %v956_v8  ;;  %v809_v30 = vadd.f32 %v793_v40, %v773_v13 }
 0x111   : > { %v663_v57 = vsel %vm298_vm0, %v549_v17, %v642_v41  ;;  %v957_v17 = vmul.f32 %v2944_v10, %v573_v34  ;;  %v901_v9 = vadd.f32 %v885_v48, %v865_v3  ;;  %v900_v11 = vadd.f32 %v884_v31, %v864_v43 }
 0x112   : > { %v886_v25 = vmul.f32 %v2958_v4, %v663_v57  ;;  %v991_v28 = vadd.f32 %v975_v2, %v955_v15  ;;  %v977_v50 = vmul.f32 %v2966_v19, %v663_v57 }
 0x114   : > { %v646_v12 = vpop.permute.xlu1 %645  ;;  %v556_v36 = vpop.permute.xlu0 %555  ;;  %v902_v33 = vadd.f32 %v886_v25, %v866_v5  ;;  %v993_v31 = vadd.f32 %v977_v50, %v957_v17 }
 0x115   : > { %v574_v22 = vsel %vm298_vm0, %v430_v60, %v556_v36  ;;  %v664_v29 = vsel %vm298_vm0, %v556_v36, %v646_v12 }
 0x116   : > { %v958_v20 = vmul.f32 %v2944_v10, %v574_v22 }
 0x118   : > { %v728_v32 = vpop.permute.xlu1 %727  ;;  %v724_v55 = vpop.permute.xlu0 %723 }
 0x119   : > { %v752_v0 = vsel %vm298_vm0, %v638_v27, %v728_v32  ;;  %v751_v63 = vsel %vm298_vm0, %v634_v21, %v724_v55  ;;  %v978_v27 = vmul.f32 %v2966_v19, %v664_v29 }
 0x11a   : > { %v921_v4 = vmul.f32 %v2963_v18, %v752_v0  ;;  %v1012_v52 = vmul.f32 %v3029_v1, %v752_v0  ;;  %v829_v61 = vmul.f32 %v2952_v14, %v751_v63  ;;  %v920_v60 = vmul.f32 %v2963_v18, %v751_v63 }
 0x11b   : > { %v1011_v38 = vmul.f32 %v3029_v1, %v751_v63  ;;  %v830_v58 = vmul.f32 %v2952_v14, %v752_v0  ;;  %v994_v36 = vadd.f32 %v978_v27, %v958_v20 }
 0x11c   : > { %v937_v35 = vadd.f32 %v921_v4, %v901_v9  ;;  %v736_v34 = vpop.permute.xlu1 %735  ;;  %v845_v46 = vadd.f32 %v829_v61, %v809_v30  ;;  %v936_v48 = vadd.f32 %v920_v60, %v900_v11  ;;  %v732_v51 = vpop.permute.xlu0 %731  ;;  %v1028_v10 = vadd.f32 %v1012_v52, %v992_v26 }
 0x11d   : > { %v754_v21 = vsel %vm298_vm0, %v646_v12, %v736_v34  ;;  %v1027_v40 = vadd.f32 %v1011_v38, %v991_v28  ;;  %v753_v13 = vsel %vm298_vm0, %v642_v41, %v732_v51  ;;  %v846_v43 = vadd.f32 %v830_v58, %v810_v23  ;;  %v288_v41 = vld [vmem:[%s3631_s4] sm:$0xff] }
 0x11e   : > { %v1014_v57 = vmul.f32 %v3029_v1, %v754_v21  ;;  %v922_v19 = vmul.f32 %v2963_v18, %v753_v13  ;;  %v1013_v14 = vmul.f32 %v3029_v1, %v753_v13  ;;  %v1044_v2 = vadd.f32 %v936_v48, %v844_v45  ;;  %v3339_v28 = vld [vmem:[%s3630_s3] ss:$0 sm:$0xff] }
 0x11f   : > { %v3307_v39 = vadd.f32 %v1043_v42, %v1027_v40  ;;  %v1045_v8 = vadd.f32 %v937_v35, %v845_v46  ;;  %v1175_v42 = vsel %vm1173_vm1, %v288_v41, 0 }
 0x120   : > { %v938_v15 = vadd.f32 %v922_v19, %v902_v33  ;;  %v1029_v12 = vadd.f32 %v1013_v14, %v993_v31  ;;  %v3311_v3 = vadd.f32 %v1044_v2, %v1028_v10  ;;  %v1030_v62 = vadd.f32 %v1014_v57, %v994_v36 }
 0x121   : > { %1103 = vrot.lane.b32.xlu0 %v3307_v39, %s2740_s25  ;;  %v3325_v5 = vand.u32 4294901760, %v1175_v42 }
 0x122   : > { %1105 = vrot.lane.b32.xlu1 %v3311_v3, %s2740_s25  ;;  %v3315_v18 = vadd.f32 %v1045_v8, %v1029_v12  ;;  %v1046_v1 = vadd.f32 %v938_v15, %v846_v43 }
 0x123   : > { %v3330_v17 = vsub.f32 %v1175_v42, %v3325_v5 }
 0x124   : > { %v3322_v45 = vadd.f32 %v1046_v1, %v1030_v62 }
 0x125   : > { %1107 = vrot.lane.b32.xlu0 %v3315_v18, %s2740_s25  ;;  %v1297_v23 = vand.u32 4294901760, %v3330_v17 }
 0x126   : > { %1109 = vrot.lane.b32.xlu1 %v3322_v45, %s2740_s25  ;;  %s2666_s25 = scalar_lea.vmem %s2665_s24, 2048 }
 0x127   : > { %v1298_v25 = vsub.f32 %v3330_v17, %v1297_v23  ;;  %2397 = vmatprep.mubr.f32.mxu0 %v1297_v23  ;;  %p2668_p2 = scmp.lt.s32.totalorder %s2666_s25, %s2660_s16 }
 0x129   : > { %v1299_v9 = vand.u32 4294901760, %v1298_v25  ;;  %p2669_p3 = por %p2668_p2, %p2667_p1 }
 0x12b   : > { %2313 = vmatprep.mubr.f32.mxu1 %v1299_v9  ;;  %p2670_p5 = pnand %p2669_p3, %p2663_p0 }
 0x133   : > { %v1080_v26 = vpop.permute.xlu0 %1079 }
 0x134   : > { %v1082_v30 = vpop.permute.xlu1 %1081  ;;  %v1127_v11 = vmax.f32 %v3063_v47, %v1080_v26 }
 0x135   : > { %v1128_v32 = vmax.f32 %v3067_v16, %v1082_v30 }
 0x137   : > { %v1084_v22 = vpop.permute.xlu0 %1083  ;;  %v1143_v29 = vmax.f32 %v1127_v11, %v1128_v32 }
 0x138   : > { %v1086_v0 = vpop.permute.xlu1 %1085  ;;  %v1129_v50 = vmax.f32 %v3071_v54, %v1084_v22 }
 0x139   : > { %v1157_v55 = vadd.f32 %v3339_v28, %v1143_v29  ;;  %v1130_v4 = vmax.f32 %v3075_v59, %v1086_v0 }
 0x13b   : > { %v1165_v52 = vmax.f32 %v1157_v55, 0.0  ;;  %v1144_v63 = vmax.f32 %v1129_v50, %v1130_v4 }
 0x13d   : > { %v1199_v47 = vsel %vm1173_vm1, %v1165_v52, 0  ;;  %v1158_v16 = vadd.f32 %v3339_v28, %v1144_v63 }
 0x13e   : > { %v1223_v33 = vand.u32 4294901760, %v1199_v47 }
 0x13f   : > { %v1166_v61 = vmax.f32 %v1158_v16, 0.0 }
 0x140   : > { %v1377_v60 = vsub.f32 %v1199_v47, %v1223_v33 }
 0x141   : > { %v1202_v38 = vsel %vm1173_vm1, %v1166_v61, 0 }
 0x142   : > { %v1226_v20 = vand.u32 4294901760, %v1202_v38  ;;  %v1378_v27 = vand.u32 4294901760, %v1377_v60 }
 0x144   : > { %v3347_v58 = vpack.c.bf16 %v1226_v20, %v1223_v33  ;;  %v1384_v35 = vsub.f32 %v1202_v38, %v1226_v20  ;;  %v1379_v54 = vsub.f32 %v1377_v60, %v1378_v27 }
 0x146   : > { %2466 = vmatprep.subr.bf16.mxu1 %v3347_v58  ;;  %2514 = vmatprep.subr.bf16.mxu0 %v3347_v58  ;;  %v1385_v59 = vand.u32 4294901760, %v1384_v35  ;;  %v3351_v34 = vpack.c.bf16 %v1384_v35, %v1377_v60  ;;  %v1380_v21 = vand.u32 4294901760, %v1379_v54 }
 0x147   : > { %2468 = vmatpush3.bf16.xpose.msra.mxu1 %v3347_v58  ;;  %2516 = vmatpush3.bf16.xpose.msra.mxu0 %v3347_v58 }
 0x148   : > { %v1386_v46 = vsub.f32 %v1384_v35, %v1385_v59  ;;  %v3355_v48 = vpack.c.bf16 %v1385_v59, %v1378_v27 }
 0x14a   : > { %v1387_v51 = vand.u32 4294901760, %v1386_v46 }
 0x14c   : > { %v3357_v40 = vpack.c.bf16 %v1387_v51, %v1380_v21 }
 0x153   : > { %v1088_v31 = vpop.permute.xlu0 %1087 }
 0x154   : > { %v1090_v57 = vpop.permute.xlu1 %1089  ;;  %v1131_v13 = vmax.f32 %v3149_v44, %v1088_v31 }
 0x155   : > { %v1132_v10 = vmax.f32 %v3153_v7, %v1090_v57 }
 0x157   : > { %v1092_v19 = vpop.permute.xlu0 %1091  ;;  %v1145_v14 = vmax.f32 %v1131_v13, %v1132_v10 }
 0x158   : > { %v1094_v2 = vpop.permute.xlu1 %1093  ;;  %v1133_v43 = vmax.f32 %v3157_v37, %v1092_v19  ;;  %v290_v19 = vld [vmem:[%s3631_s4 + $0x10] sm:$0xff] }
 0x159   : > { %v1159_v36 = vadd.f32 %v3339_v28, %v1145_v14  ;;  %v1134_v15 = vmax.f32 %v3161_v53, %v1094_v2  ;;  %v291_v14 = vld [vmem:[%s3631_s4 + $0x18] sm:$0xff] }
 0x15b   : > { %v1167_v12 = vmax.f32 %v1159_v36, 0.0  ;;  %v1146_v8 = vmax.f32 %v1133_v43, %v1134_v15  ;;  %v292_v15 = vld [vmem:[%s3631_s4 + $0x20] sm:$0xff] }
 0x15d   : > { %v1205_v62 = vsel %vm1173_vm1, %v1167_v12, 0  ;;  %v1160_v1 = vadd.f32 %v3339_v28, %v1146_v8  ;;  %v1181_v12 = vsel %vm1173_vm1, %v290_v19, 0  ;;  %v1184_v8 = vsel %vm1173_vm1, %v291_v14, 0 }
 0x15e   : > { %v1229_v41 = vand.u32 4294901760, %v1205_v62 }
 0x15f   : > { %v1168_v42 = vmax.f32 %v1160_v1, 0.0 }
 0x160   : > { %v1391_v44 = vsub.f32 %v1205_v62, %v1229_v41 }
 0x161   : > { %v1208_v7 = vsel %vm1173_vm1, %v1168_v42, 0 }
 0x162   : > { %v1232_v23 = vand.u32 4294901760, %v1208_v7  ;;  %v1392_v25 = vand.u32 4294901760, %v1391_v44 }
 0x164   : > { %v3367_v9 = vpack.c.bf16 %v1232_v23, %v1229_v41  ;;  %v1398_v26 = vsub.f32 %v1208_v7, %v1232_v23  ;;  %v1393_v37 = vsub.f32 %v1391_v44, %v1392_v25  ;;  %v1187_v41 = vsel %vm1173_vm1, %v292_v15, 0 }
 0x165   : > { %v3428_v7 = vand.u32 4294901760, %v1184_v8 }
 0x166   : > { %2470 = vmatprep.subr.bf16.mxu1 %v3367_v9  ;;  %2518 = vmatprep.subr.bf16.mxu0 %v3367_v9  ;;  %v1399_v53 = vand.u32 4294901760, %v1398_v26  ;;  %v3371_v30 = vpack.c.bf16 %v1398_v26, %v1391_v44  ;;  %v1394_v22 = vand.u32 4294901760, %v1393_v37  ;;  %v3426_v44 = vand.u32 4294901760, %v1181_v12 }
 0x167   : > { %2472 = vmatpush3.bf16.xpose.msra.mxu1 %v3367_v9  ;;  %2520 = vmatpush3.bf16.xpose.msra.mxu0 %v3367_v9 }
 0x168   : > { %v1400_v11 = vsub.f32 %v1398_v26, %v1399_v53  ;;  %v3375_v32 = vpack.c.bf16 %v1399_v53, %v1392_v25  ;;  %v3431_v26 = vand.u32 4294901760, %v1187_v41  ;;  %v294_v53 = vld [vmem:[%s3631_s4 + $0x30] sm:$0xff] }
 0x16a   : > { %v1401_v29 = vand.u32 4294901760, %v1400_v11 }
 0x16c   : > { %v3377_v0 = vpack.c.bf16 %v1401_v29, %v1394_v22  ;;  %v3443_v29 = vsub.f32 %v1181_v12, %v3426_v44 }
 0x173   : > { %v1096_v55 = vpop.permute.xlu0 %1095 }
 0x174   : > { %v1098_v50 = vpop.permute.xlu1 %1097  ;;  %v1135_v4 = vmax.f32 %v3230_v49, %v1096_v55  ;;  %v3446_v55 = vsub.f32 %v1184_v8, %v3428_v7 }
 0x175   : > { %v1136_v52 = vmax.f32 %v3234_v24, %v1098_v50 }
 0x177   : > { %v1100_v63 = vpop.permute.xlu0 %1099  ;;  %v1147_v47 = vmax.f32 %v1135_v4, %v1136_v52 }
 0x178   : > { %v1102_v16 = vpop.permute.xlu1 %1101  ;;  %v1137_v61 = vmax.f32 %v3238_v6, %v1100_v63  ;;  %v1193_v63 = vsel %vm1173_vm1, %v294_v53, 0 }
 0x179   : > { %v1161_v33 = vadd.f32 %v3339_v28, %v1147_v47  ;;  %v1138_v60 = vmax.f32 %v3242_v56, %v1102_v16  ;;  %v289_v56 = vld [vmem:[%s3631_s4 + $0x8] sm:$0xff]  ;;  %v3452_v47 = vsub.f32 %v1187_v41, %v3431_v26 }
 0x17a   : > { %v1178_v13 = vsel %vm1173_vm1, %v289_v56, 0 }
 0x17b   : > { %v1169_v38 = vmax.f32 %v1161_v33, 0.0  ;;  %v1148_v20 = vmax.f32 %v1137_v61, %v1138_v60  ;;  %v1317_v61 = vand.u32 4294901760, %v3443_v29  ;;  %v1327_v60 = vand.u32 4294901760, %v3446_v55 }
 0x17c   : > { %v1337_v56 = vand.u32 4294901760, %v3452_v47 }
 0x17d   : > { %v1162_v27 = vadd.f32 %v3339_v28, %v1148_v20  ;;  %v3386_v35 = vsel %vm1173_vm1, %v1169_v38, 0  ;;  %v3459_v38 = vand.u32 4294901760, %v1193_v63 }
 0x17e   : > { %v1235_v24 = vand.u32 4294901760, %v3386_v35 }
 0x17f   : > { %v1170_v54 = vmax.f32 %v1162_v27, 0.0 }
 0x181   : > { %v1214_v49 = vsel %vm1173_vm1, %v1170_v54, 0 }
 0x182   : > { %v1238_v59 = vand.u32 4294901760, %v1214_v49 }
 0x184   : > { %v3390_v46 = vpack.c.bf16 %v1238_v59, %v1235_v24  ;;  %v3461_v20 = vsub.f32 %v1214_v49, %v1238_v59  ;;  %v3475_v49 = vsub.f32 %v3386_v35, %v1235_v24  ;;  %v1318_v59 = vsub.f32 %v3443_v29, %v1317_v61 }
 0x185   : > { %v1338_v35 = vsub.f32 %v3452_v47, %v1337_v56 }
 0x186   : > { %2474 = vmatprep.subr.bf16.mxu1 %v3390_v46  ;;  %2522 = vmatprep.subr.bf16.mxu0 %v3390_v46  ;;  %v1406_v24 = vand.u32 4294901760, %v3475_v49  ;;  %v1319_v19 = vand.u32 4294901760, %v1318_v59 }
 0x187   : > { %2476 = vmatpush3.bf16.xpose.msra.mxu1 %v3390_v46  ;;  %2524 = vmatpush3.bf16.xpose.msra.mxu0 %v3390_v46  ;;  %v1339_v12 = vand.u32 4294901760, %v1338_v35 }
 0x193   : > { %v1104_v6 = vpop.permute.xlu0 %1103 }
 0x194   : > { %v1106_v21 = vpop.permute.xlu1 %1105  ;;  %v1139_v51 = vmax.f32 %v3307_v39, %v1104_v6 }
 0x195   : > { %v1140_v31 = vmax.f32 %v3311_v3, %v1106_v21  ;;  %v3411_v3 = vand.u32 4294901760, %v1178_v13  ;;  %v1328_v21 = vsub.f32 %v3446_v55, %v1327_v60 }
 0x197   : > { %v1108_v57 = vpop.permute.xlu0 %1107  ;;  %v1149_v10 = vmax.f32 %v1139_v51, %v1140_v31  ;;  %v3424_v42 = vsub.f32 %v1178_v13, %v3411_v3  ;;  %v3482_v51 = vsub.f32 %v1193_v63, %v3459_v38  ;;  %v1329_v14 = vand.u32 4294901760, %v1328_v21 }
 0x198   : > { %v1110_v2 = vpop.permute.xlu1 %1109  ;;  %v1141_v43 = vmax.f32 %v3315_v18, %v1108_v57  ;;  %v293_v18 = vld [vmem:[%s3631_s4 + $0x28] sm:$0xff]  ;;  %v1413_v57 = vand.u32 4294901760, %v3461_v20 }
 0x199   : > { %v1163_v36 = vadd.f32 %v3339_v28, %v1149_v10  ;;  %v1142_v39 = vmax.f32 %v3322_v45, %v1110_v2  ;;  %v1190_v37 = vsel %vm1173_vm1, %v293_v18, 0  ;;  %v1307_v22 = vand.u32 4294901760, %v3424_v42 }
 0x19a   : > { %v3448_v52 = vand.u32 4294901760, %v1190_v37  ;;  %v1357_v2 = vand.u32 4294901760, %v3482_v51  ;;  %v2537_v53 = vpack.c.bf16 %v1413_v57, %v1406_v24 }
 0x19b   : > { %v1171_v62 = vmax.f32 %v1163_v36, 0.0  ;;  %v1150_v1 = vmax.f32 %v1141_v43, %v1142_v39  ;;  %v1308_v27 = vsub.f32 %v3424_v42, %v1307_v22  ;;  %v1414_v43 = vsub.f32 %v3461_v20, %v1413_v57 }
 0x19c   : > { %v3467_v54 = vsub.f32 %v1190_v37, %v3448_v52 }
 0x19d   : > { %v1164_v45 = vadd.f32 %v3339_v28, %v1150_v1  ;;  %v1217_v23 = vsel %vm1173_vm1, %v1171_v62, 0  ;;  %v295_v28 = vld [vmem:[%s3631_s4 + $0x38] sm:$0xff]  ;;  %v1309_v31 = vand.u32 4294901760, %v1308_v27  ;;  %v1407_v62 = vsub.f32 %v3475_v49, %v1406_v24 }
 0x19e   : > { %v1241_v50 = vand.u32 4294901760, %v1217_v23  ;;  %v1196_v16 = vsel %vm1173_vm1, %v295_v28, 0  ;;  %v1347_v13 = vand.u32 4294901760, %v3467_v54  ;;  %v1358_v1 = vsub.f32 %v3482_v51, %v1357_v2 }
 0x19f   : > { %v1172_v25 = vmax.f32 %v1164_v45, 0.0  ;;  %v3469_v6 = vand.u32 4294901760, %v1196_v16  ;;  %v1415_v41 = vand.u32 4294901760, %v1414_v43  ;;  %v1408_v45 = vand.u32 4294901760, %v1407_v62 }
 0x1a0   : > { %v1348_v39 = vsub.f32 %v3467_v54, %v1347_v13  ;;  %v3499_v8 = vsub.f32 %v1217_v23, %v1241_v50 }
 0x1a1   : > { %v1220_v11 = vsel %vm1173_vm1, %v1172_v25, 0  ;;  %v3487_v10 = vsub.f32 %v1196_v16, %v3469_v6  ;;  %v1359_v25 = vand.u32 4294901760, %v1358_v1  ;;  %v2489_v37 = vpack.c.bf16 %v1415_v41, %v1408_v45 }
 0x1a2   : > { %v1244_v4 = vand.u32 4294901760, %v1220_v11  ;;  %v1420_v23 = vand.u32 4294901760, %v3499_v8 }
 0x1a3   : > { %v1367_v15 = vand.u32 4294901760, %v3487_v10 }
 0x1a4   : > { %v3455_v33 = vpack.c.bf16 %v1244_v4, %v1241_v50  ;;  %v3492_v36 = vsub.f32 %v1220_v11, %v1244_v4 }
 0x1a6   : > { %2478 = vmatprep.subr.bf16.mxu1 %v3455_v33  ;;  %2526 = vmatprep.subr.bf16.mxu0 %v3455_v33  ;;  %v1427_v18 = vand.u32 4294901760, %v3492_v36 }
 0x1a7   : > { %2480 = vmatpush3.bf16.xpose.msra.mxu1 %v3455_v33  ;;  %2528 = vmatpush3.bf16.xpose.msra.mxu0 %v3455_v33 }
 0x1a8   : > { %2482 = vmatprep.subr.bf16.mxu1 %v3357_v40  ;;  %2530 = vmatprep.subr.bf16.mxu0 %v3355_v48  ;;  %v1428_v28 = vsub.f32 %v3492_v36, %v1427_v18  ;;  %v2541_v16 = vpack.c.bf16 %v1427_v18, %v1420_v23 }
 0x1aa   : > { %v1429_v50 = vand.u32 4294901760, %v1428_v28 }
 0x1ae   : > { %2314 = vmatmul.mubr.f32.vlgmr.msra.gmra.mrb[0].mxu1 %v1309_v31  ;;  %2398 = vmatmul.mubr.f32.vlgmr.msra.gmra.mrb[0].mxu0 %v1307_v22  ;;  %v1421_v22 = vsub.f32 %v3499_v8, %v1420_v23 }
 0x1af   : > { %2484 = vmatpush3.bf16.xpose.msra.mxu1 %v3357_v40  ;;  %2532 = vmatpush3.bf16.xpose.msra.mxu0 %v3355_v48  ;;  %v1349_v40 = vand.u32 4294901760, %v1348_v39  ;;  %v1368_v48 = vsub.f32 %v3487_v10, %v1367_v15 }
 0x1b0   : > { %2486 = vmatprep.subr.bf16.mxu1 %v3377_v0  ;;  %2534 = vmatprep.subr.bf16.mxu0 %v3375_v32  ;;  %v1422_v4 = vand.u32 4294901760, %v1421_v22 }
 0x1b1   : > { %2316 = vmatprep.mubr.f32.mxu1 %v1319_v19  ;;  %2400 = vmatprep.mubr.f32.mxu0 %v1317_v61  ;;  %v1369_v11 = vand.u32 4294901760, %v1368_v48 }
 0x1b2   : > { %2317 = vmatmul.mubr.f32.gmra.mrb[2].mxu1 %v1329_v14  ;;  %2401 = vmatmul.mubr.f32.gmra.mrb[2].mxu0 %v1327_v60  ;;  %v2493_v63 = vpack.c.bf16 %v1429_v50, %v1422_v4 }
 0x1b3   : > { %2319 = vmatprep.mubr.f32.mxu1 %v1339_v12  ;;  %2403 = vmatprep.mubr.f32.mxu0 %v1337_v56 }
 0x1b6   : > { %2320 = vmatmul.mubr.f32.gmra.mrb[4].mxu1 %v1349_v40  ;;  %2404 = vmatmul.mubr.f32.gmra.mrb[4].mxu0 %v1347_v13 }
 0x1b7   : > { %2488 = vmatpush3.bf16.xpose.msra.mxu1 %v3377_v0  ;;  %2536 = vmatpush3.bf16.xpose.msra.mxu0 %v3375_v32 }
 0x1b8   : > { %2490 = vmatprep.subr.bf16.mxu1 %v2489_v37  ;;  %2538 = vmatprep.subr.bf16.mxu0 %v2537_v53 }
 0x1b9   : > { %2322 = vmatprep.mubr.f32.mxu1 %v1359_v25  ;;  %2406 = vmatprep.mubr.f32.mxu0 %v1357_v2 }
 0x1ba   : > { %2323 = vmatmul.mubr.f32.gmra.mrb[6].mxu1 %v1369_v11  ;;  %2407 = vmatmul.mubr.f32.gmra.mrb[6].mxu0 %v1367_v15 }
 0x1bb   : > { %2341 = vmatprep.mubr.f32.mxu1 %v3325_v5  ;;  %2425 = vmatprep.mubr.f32.mxu0 %v3325_v5 }
 0x1bf   : > { %2492 = vmatpush3.bf16.xpose.msra.mxu1 %v2489_v37  ;;  %2540 = vmatpush3.bf16.xpose.msra.mxu0 %v2537_v53 }
 0x1c0   : > { %2494 = vmatprep.subr.bf16.mxu1 %v2493_v63  ;;  %2542 = vmatprep.subr.bf16.mxu0 %v2541_v16 }
 0x1c7   : > { %2496 = vmatpush3.bf16.xpose.msra.mxu1 %v2493_v63  ;;  %2544 = vmatpush3.bf16.xpose.msra.mxu0 %v2541_v16 }
 0x1c8   : > { %2498 = vmatprep.subr.bf16.mxu1 %v3351_v34  ;;  %2546 = vmatprep.subr.bf16.mxu0 %v3347_v58 }
 0x1ce   : > { %2342 = vmatmul.mubr.f32.vlgmr.msra.gmra.mrb[0].mxu1 %v3411_v3  ;;  %2426 = vmatmul.mubr.f32.vlgmr.msra.gmra.mrb[0].mxu0 %v3411_v3 }
 0x1cf   : > { %2500 = vmatpush3.bf16.xpose.msra.mxu1 %v3351_v34  ;;  %2548 = vmatpush3.bf16.xpose.msra.mxu0 %v3347_v58  ;;  %v2505_v34 = vpack.c.bf16 %v3461_v20, %v3475_v49  ;;  %v2509_v58 = vpack.c.bf16 %v3492_v36, %v3499_v8 }
 0x1d0   : > { %2502 = vmatprep.subr.bf16.mxu1 %v3371_v30  ;;  %2550 = vmatprep.subr.bf16.mxu0 %v3367_v9 }
 0x1d1   : > { %2344 = vmatprep.mubr.f32.mxu1 %v3426_v44  ;;  %2428 = vmatprep.mubr.f32.mxu0 %v3426_v44 }
 0x1d2   : > { %2345 = vmatmul.mubr.f32.gmra.mrb[2].mxu1 %v3428_v7  ;;  %2429 = vmatmul.mubr.f32.gmra.mrb[2].mxu0 %v3428_v7 }
 0x1d3   : > { %2347 = vmatprep.mubr.f32.mxu1 %v3431_v26  ;;  %2431 = vmatprep.mubr.f32.mxu0 %v3431_v26 }
 0x1d6   : > { %2348 = vmatmul.mubr.f32.gmra.mrb[4].mxu1 %v3448_v52  ;;  %2432 = vmatmul.mubr.f32.gmra.mrb[4].mxu0 %v3448_v52 }
 0x1d7   : > { %2504 = vmatpush3.bf16.xpose.msra.mxu1 %v3371_v30  ;;  %2552 = vmatpush3.bf16.xpose.msra.mxu0 %v3367_v9 }
 0x1d8   : > { %2506 = vmatprep.subr.bf16.mxu1 %v2505_v34  ;;  %2554 = vmatprep.subr.bf16.mxu0 %v3390_v46 }
 0x1d9   : > { %2350 = vmatprep.mubr.f32.mxu1 %v3459_v38  ;;  %2434 = vmatprep.mubr.f32.mxu0 %v3459_v38 }
 0x1da   : > { %2351 = vmatmul.mubr.f32.gmra.mrb[6].mxu1 %v3469_v6  ;;  %2435 = vmatmul.mubr.f32.gmra.mrb[6].mxu0 %v3469_v6 }
 0x1db   : > { %2369 = vmatprep.mubr.f32.mxu1 %v3330_v17  ;;  %2453 = vmatprep.mubr.f32.mxu0 %v3325_v5 }
 0x1df   : > { %2508 = vmatpush3.bf16.xpose.msra.mxu1 %v2505_v34  ;;  %2556 = vmatpush3.bf16.xpose.msra.mxu0 %v3390_v46 }
 0x1e0   : > { %2510 = vmatprep.subr.bf16.mxu1 %v2509_v58  ;;  %2558 = vmatprep.subr.bf16.mxu0 %v3455_v33 }
 0x1e7   : > { %2512 = vmatpush3.bf16.xpose.msra.mxu1 %v2509_v58  ;;  %2560 = vmatpush3.bf16.xpose.msra.mxu0 %v3455_v33 }
 0x1ee   : > { %2370 = vmatmul.mubr.f32.vlgmr.msra.gmra.mrb[0].mxu1 %v3424_v42  ;;  %2454 = vmatmul.mubr.f32.vlgmr.msra.gmra.mrb[0].mxu0 %v3411_v3 }
 0x1ef   : > { %2372 = vmatprep.mubr.f32.mxu1 %v3443_v29  ;;  %2456 = vmatprep.mubr.f32.mxu0 %v3426_v44 }
 0x1f2   : > { %2373 = vmatmul.mubr.f32.gmra.mrb[2].mxu1 %v3446_v55  ;;  %2457 = vmatmul.mubr.f32.gmra.mrb[2].mxu0 %v3428_v7 }
 0x1f3   : > { %2375 = vmatprep.mubr.f32.mxu1 %v3452_v47  ;;  %2459 = vmatprep.mubr.f32.mxu0 %v3431_v26 }
 0x1f6   : > { %2376 = vmatmul.mubr.f32.gmra.mrb[4].mxu1 %v3467_v54  ;;  %2460 = vmatmul.mubr.f32.gmra.mrb[4].mxu0 %v3448_v52 }
 0x1f7   : > { %2378 = vmatprep.mubr.f32.mxu1 %v3482_v51  ;;  %2462 = vmatprep.mubr.f32.mxu0 %v3459_v38 }
 0x1fa   : > { %2379 = vmatmul.mubr.f32.gmra.mrb[6].mxu1 %v3487_v10  ;;  %2463 = vmatmul.mubr.f32.gmra.mrb[6].mxu0 %v3469_v6 }
 0x2c1   : > { %v2371_v5 = vpop.f32.mrb[0].mxu1  ;;  %v2455_v17 = vpop.f32.mrb[0].mxu0 }
 0x2c2   : > { %v2561_v9 = vadd.f32 %v2455_v17, %v2371_v5  ;;  %v1612_v30 = vpop.f32.mrb[1].mxu1  ;;  %v2014_v32 = vpop.f32.mrb[1].mxu0 }
 0x2c3   : > { %v2562_v0 = vadd.f32 %v2014_v32, %v1612_v30 }
 0x2c4   : > { %2061 = vst.msk [vmem:[%s266_s10 + $0x8] sm:$0xff] %vm1173_vm1, %v2561_v9 }
 0x2c5   : > { %2060 = vst.msk [vmem:[%s266_s10] sm:$0xff] %vm1173_vm1, %v2562_v0  ;;  %v2374_v46 = vpop.f32.mrb[2].mxu1  ;;  %v2458_v3 = vpop.f32.mrb[2].mxu0 }
 0x2c6   : > { %v2563_v42 = vadd.f32 %v2458_v3, %v2374_v46  ;;  %v1626_v44 = vpop.f32.mrb[3].mxu1  ;;  %v2026_v7 = vpop.f32.mrb[3].mxu0 }
 0x2c7   : > { %v2564_v26 = vadd.f32 %v2026_v7, %v1626_v44 }
 0x2c8   : > { %2063 = vst.msk [vmem:[%s266_s10 + $0x18] sm:$0xff] %vm1173_vm1, %v2563_v42 }
 0x2c9   : > { %2062 = vst.msk [vmem:[%s266_s10 + $0x10] sm:$0xff] %vm1173_vm1, %v2564_v26  ;;  %v2377_v29 = vpop.f32.mrb[4].mxu1  ;;  %v2461_v55 = vpop.f32.mrb[4].mxu0 }
 0x2ca   : > { %v2565_v52 = vadd.f32 %v2461_v55, %v2377_v29  ;;  %v1640_v47 = vpop.f32.mrb[5].mxu1  ;;  %v2038_v33 = vpop.f32.mrb[5].mxu0 }
 0x2cb   : > { %v2566_v61 = vadd.f32 %v2038_v33, %v1640_v47 }
 0x2cc   : > { %2065 = vst.msk [vmem:[%s266_s10 + $0x28] sm:$0xff] %vm1173_vm1, %v2565_v52 }
 0x2cd   : > { %2064 = vst.msk [vmem:[%s266_s10 + $0x20] sm:$0xff] %vm1173_vm1, %v2566_v61  ;;  %v2380_v60 = vpop.f32.mrb[6].mxu1  ;;  %v2464_v38 = vpop.f32.mrb[6].mxu0 }
 0x2ce   : > { %v2567_v20 = vadd.f32 %v2464_v38, %v2380_v60  ;;  %v1654_v27 = vpop.f32.mrb[7].mxu1  ;;  %v2050_v54 = vpop.f32.mrb[7].mxu0 }
 0x2cf   : > { %v2568_v6 = vadd.f32 %v2050_v54, %v1654_v27 }
 0x2d0   : > { %2067 = vst.msk [vmem:[%s266_s10 + $0x38] sm:$0xff] %vm1173_vm1, %v2567_v20 }
 0x2d1   : > { %2066 = vst.msk [vmem:[%s266_s10 + $0x30] sm:$0xff] %vm1173_vm1, %v2568_v6 }
 0x2d2   : > { %2673 = shalt.err (!%p2670_p5)
}
 0x2d3   : > { %s2674_s27 = scalar_lea.hbm %s3573_s15, 1024  ;;  %s2678_s8 = scalar_lea.hbm %s3632_s5, 2048 }
 0x2d4   : > { %p2675_p6 = scmp.ne.s32.totalorder %s3573_s15, %s2674_s27  ;;  %p2679_p10 = scmp.lt.u32.totalorder %s3573_s15, %s3632_s5 }
 0x2d5   : > { %p2680_p11 = scmp.lt.u32.totalorder %s2678_s8, %s2674_s27  ;;  %p2682_p13 = scmp.lt.u32.totalorder %s2674_s27, %s3573_s15 }
 0x2d6   : > { %p2676_p7 = pnand %p2675_p6, %p2814_p4 }
 0x2d7   : > { %p2681_p12 = por %p2680_p11, %p2679_p10 }
 0x2d8   : > { %p2677_p9 = pneg %p2676_p7 }
 0x2d9   : > { %p2683_p0 = por %p2682_p13, %p2681_p12 }
 0x2db   : > { %p2684_p1 = pnand %p2683_p0, %p2677_p9 }
 0x2dd   : > { %2687 = shalt.err (!%p2684_p1)
}
 0x2de   : > { %s2742_s11 = smov 128   ;;  %s2743_s13 = smov 8  }
 0x2df   : > { %2602 = dma.vmem_to_hbm [thread:$0]  (%p2814_p4), %s3575_s12, 1024, %s3573_s15, %s3581_s21, %s2742_s11, %s2742_s11, %s2743_s13  }
 0x2e0 PF: > { %p2608_p2 = scmp.ge.s32.totalorder %s2738_s23, 2  ;;  %s2098_s14 = sand.u32 1, %s2718_s18  }
 0x2e1   : > { %s2099_s16 = scalar_lea.sflag [#allocation3], %s2098_s14 }
 0x2e2   : > { %p2605_p3 = pnand %p2608_p2, %p2821_p8 }
 0x2e4   : > { %2713 = dma.done.wait (!%p2605_p3), %s2099_s16, 1024  }
 0x2e5   : > { %2715 = vsyncadd (!%p2605_p3), %s2099_s16, 4294966272  ;;  %s18_s23 = sadd.s32 1, %s2738_s23   ;;  %s3635_s18 = smov %s2722_s19 }
 0x2e6   : > { %p15_p5 = scmp.ge.s32.totalorder %s18_s23, 4   ;;  %s3636_s19 = smov %s2726_s20 }
 0x2e7   : > { %s3637_s20 = smov %s2827_s6  ;;  %s3638_s21 = smov %s2734_s22 }
 0x2e8   : > { %s3639_s22 = smov %s3641_s26  ;;  %17 = sbr.rel (!%p15_p5) target bundleno = 4 (0x4), region = 78 }
 0x2ef   :  { %2104 = vsyncpa [#allocation3], 1 }
 0x2f0   :  { %2106 = vsyncpa [#allocation3 + $0x1], 1 }

</bundles_post_ra>
